<compile_context>
chip_gen: v7x
topology: tpu7x:2x2x1
jax: 0.10.0
libtpu: 0.0.40
codegen_flags: <defaults>
</compile_context>

<pallas_src>
import functools

import jax
import jax.numpy as jnp
from jax.experimental import pallas as pl
from jax.experimental.pallas import tpu as pltpu

_LANE = 128      # lane width (last dim)
_SUBLANE = 8     # sublane width (second-to-last dim)


def _pad_axis(x, axis, mult):
    """Zero-pad `axis` of x up to a multiple of `mult` (no-op if aligned)."""
    size = x.shape[axis]
    rem = (-size) % mult
    if rem == 0:
        return x
    pads = [(0, 0)] * x.ndim
    pads[axis] = (0, rem)
    return jnp.pad(x, pads)


# ----------------------------------------------------------------------------
# Kernels
# ----------------------------------------------------------------------------
def _gen_kernel(z_ref, c_ref, w1z_ref, w1c_ref, b1_ref, w3_ref, b3_ref,
                x_ref, x1_ref):
    """h = lrelu(z@W1z + c@W1c + b1); x1 = h; x = h@W3 + b3."""
    h = jnp.dot(z_ref[...].astype(jnp.bfloat16), w1z_ref[...],
                preferred_element_type=jnp.float32)
    h = h + jnp.dot(c_ref[...].astype(jnp.bfloat16), w1c_ref[...],
                    preferred_element_type=jnp.float32)
    h = h + b1_ref[...]                       # [bb,H0] + [1,H0]
    h = jnp.where(h > 0, h, 0.2 * h)          # LeakyReLU(0.2)
    x1_ref[...] = h
    x = jnp.dot(h.astype(jnp.bfloat16), w3_ref[...],
                preferred_element_type=jnp.float32)
    x_ref[...] = x + b3_ref[...]


def _gen_feedback_kernel(a1_ref, z_ref, c_ref, fb_ref, w1z_ref, w1c_ref,
                         b1_ref, w3_ref, b3_ref, x_ref, x1_ref):
    """Feedback path: feedback_out = lrelu(fc1) + a1*fb ; x = fc3(feedback_out)."""
    h = jnp.dot(z_ref[...].astype(jnp.bfloat16), w1z_ref[...],
                preferred_element_type=jnp.float32)
    h = h + jnp.dot(c_ref[...].astype(jnp.bfloat16), w1c_ref[...],
                    preferred_element_type=jnp.float32)
    h = h + b1_ref[...]
    h = jnp.where(h > 0, h, 0.2 * h)
    h = h + a1_ref[0, 0] * fb_ref[...]        # a1 scalar from SMEM
    x1_ref[...] = h                           # == feedback_out
    x = jnp.dot(h.astype(jnp.bfloat16), w3_ref[...],
                preferred_element_type=jnp.float32)
    x_ref[...] = x + b3_ref[...]


# ----------------------------------------------------------------------------
# Wrapper
# ----------------------------------------------------------------------------
def _generator_impl(z, c, w1z, w1c, b1, w3, b3, a1, fb, block_b):
    B, L = z.shape
    A = c.shape[1]
    H0 = w1z.shape[1]
    H1 = w3.shape[1]

    # --- pad feature dims to lane width (zeros keep the math exact) ---------
    z_p = _pad_axis(z.astype(jnp.float32), 1, _LANE)
    c_p = _pad_axis(c.astype(jnp.float32), 1, _LANE)
    w1z_p = _pad_axis(_pad_axis(w1z.astype(jnp.bfloat16), 0, _LANE), 1, _LANE)
    w1c_p = _pad_axis(_pad_axis(w1c.astype(jnp.bfloat16), 0, _LANE), 1, _LANE)
    b1_p = _pad_axis(b1.astype(jnp.float32), 1, _LANE)
    w3_p = _pad_axis(_pad_axis(w3.astype(jnp.bfloat16), 0, _LANE), 1, _LANE)
    b3_p = _pad_axis(b3.astype(jnp.float32), 1, _LANE)

    # --- batch tiling --------------------------------------------------------
    block_b = max(_SUBLANE, (int(block_b) // _SUBLANE) * _SUBLANE)
    b8 = B + ((-B) % _SUBLANE)
    bb = min(block_b, b8)
    z_p = _pad_axis(z_p, 0, bb)
    c_p = _pad_axis(c_p, 0, bb)

    Bp, Lp = z_p.shape
    Ap = c_p.shape[1]
    H0p = w1z_p.shape[1]
    H1p = w3_p.shape[1]
    grid = (Bp // bb,)

    def row_spec(n):  # batch-tiled tensors
        return pl.BlockSpec((bb, n), lambda i: (i, 0))

    def resident(arr):  # weights / biases stay resident in VMEM
        return pl.BlockSpec(arr.shape, lambda i: (0, 0))

    out_shape = (jax.ShapeDtypeStruct((Bp, H1p), jnp.float32),
                 jax.ShapeDtypeStruct((Bp, H0p), jnp.float32))
    out_specs = (row_spec(H1p), row_spec(H0p))
    params = pltpu.CompilerParams(
        dimension_semantics=("parallel",),          # shards across TCs on v7x
        vmem_limit_bytes=32 * 1024 * 1024,          # safe for v7x's 64 MiB VMEM
    )

    if fb is None:
        x_p, x1_p = pl.pallas_call(
            _gen_kernel,
            grid=grid,
            in_specs=[row_spec(Lp), row_spec(Ap),
                      resident(w1z_p), resident(w1c_p), resident(b1_p),
                      resident(w3_p), resident(b3_p)],
            out_specs=out_specs,
            out_shape=out_shape,
            compiler_params=params,
        )(z_p, c_p, w1z_p, w1c_p, b1_p, w3_p, b3_p)
    else:
        fb_p = _pad_axis(_pad_axis(fb.astype(jnp.float32), 1, _LANE), 0, bb)
        a1_arr = jnp.asarray(a1, jnp.float32).reshape(1, 1)
        x_p, x1_p = pl.pallas_call(
            _gen_feedback_kernel,
            grid=grid,
            in_specs=[pl.BlockSpec((1, 1), lambda i: (0, 0),
                                   memory_space=pltpu.SMEM),
                      row_spec(Lp), row_spec(Ap), row_spec(H0p),
                      resident(w1z_p), resident(w1c_p), resident(b1_p),
                      resident(w3_p), resident(b3_p)],
            out_specs=out_specs,
            out_shape=out_shape,
            compiler_params=params,
        )(a1_arr, z_p, c_p, fb_p, w1z_p, w1c_p, b1_p, w3_p, b3_p)

    # slice away any padding (no-op when shapes were already aligned)
    return x_p[:B, :H1], x1_p[:B, :H0]


@functools.partial(jax.jit, static_argnames=("block_b",))
def generator_forward(z, c, w1z, w1c, b1, w3, b3, *, block_b=256):
    """Default path (feedback_layers=None). Returns (x, x1) with x1 == self.out."""
    return _generator_impl(z, c, w1z, w1c, b1, w3, b3, None, None, block_b)


@functools.partial(jax.jit, static_argnames=("block_b",))
def generator_forward_feedback(z, c, a1, feedback_layers, w1z, w1c, b1, w3, b3,
                               *, block_b=256):
    """Feedback path. Returns (x, feedback_out); PyTorch module returns only x."""
    return _generator_impl(z, c, w1z, w1c, b1, w3, b3, a1, feedback_layers,
                           block_b)


# ----------------------------------------------------------------------------
# Parameter init (mirrors weights_init: N(0, 0.02) weights, 0 bias).
# W1 is pre-split into the z-part and c-part; weights stored in bf16 for the MXU.
# ----------------------------------------------------------------------------
def init_generator_params(key, latent_size, attsize, layer_sizes):
    in_size = latent_size + attsize
    k1, k3 = jax.random.split(key, 2)
    w1 = 0.02 * jax.random.normal(k1, (in_size, layer_sizes[0]), jnp.float32)
    w3 = 0.02 * jax.random.normal(k3, (layer_sizes[0], layer_sizes[1]),
                                  jnp.float32)
    b1 = jnp.zeros((1, layer_sizes[0]), jnp.float32)
    b3 = jnp.zeros((1, layer_sizes[1]), jnp.float32)
    w1z = w1[:latent_size].astype(jnp.bfloat16)
    w1c = w1[latent_size:].astype(jnp.bfloat16)
    return w1z, w1c, b1, w3.astype(jnp.bfloat16), b3


# ----------------------------------------------------------------------------
# Pure-JAX reference (same bf16 operand / f32 accumulation recipe)
# ----------------------------------------------------------------------------
def _ref_forward(z, c, w1z, w1c, b1, w3, b3, a1=None, fb=None):
    h = (jnp.dot(z.astype(jnp.bfloat16), w1z, preferred_element_type=jnp.float32)
         + jnp.dot(c.astype(jnp.bfloat16), w1c, preferred_element_type=jnp.float32)
         + b1)
    h = jnp.where(h > 0, h, 0.2 * h)
    if fb is not None:
        h = h + a1 * fb
    x = jnp.dot(h.astype(jnp.bfloat16), w3,
                preferred_element_type=jnp.float32) + b3
    return x, h


if __name__ == "__main__":
    # lane-aligned small shapes (all dims multiples of 128 -> no padding path)
    batch = 256
    latent_size = 128
    attsize = 128
    layer_sizes = [256, 256]   # decoder_layer_sizes

    key = jax.random.PRNGKey(0)
    kp, kz, kc, kf = jax.random.split(key, 4)
    w1z, w1c, b1, w3, b3 = init_generator_params(kp, latent_size, attsize,
                                                 layer_sizes)

    z = jax.random.normal(kz, (batch, latent_size), jnp.float32)
    c = jax.random.normal(kc, (batch, attsize), jnp.float32)
    fb = jax.random.normal(kf, (batch, layer_sizes[0]), jnp.float32)
    a1 = 0.5

    # default path
    x, x1 = generator_forward(z, c, w1z, w1c, b1, w3, b3)
    jax.block_until_ready((x, x1))
    x_ref, x1_ref = _ref_forward(z, c, w1z, w1c, b1, w3, b3)
    assert x.shape == (batch, layer_sizes[1]) and x1.shape == (batch, layer_sizes[0])
    assert jnp.allclose(x, x_ref, atol=1e-3, rtol=1e-3), "default x mismatch"
    assert jnp.allclose(x1, x1_ref, atol=1e-3, rtol=1e-3), "default x1 mismatch"

    # feedback path
    xf, x1f = generator_forward_feedback(z, c, a1, fb, w1z, w1c, b1, w3, b3)
    jax.block_until_ready((xf, x1f))
    xf_ref, x1f_ref = _ref_forward(z, c, w1z, w1c, b1, w3, b3, a1=a1, fb=fb)
    assert jnp.allclose(xf, xf_ref, atol=1e-3, rtol=1e-3), "feedback x mismatch"
    assert jnp.allclose(x1f, x1f_ref, atol=1e-3, rtol=1e-3), "feedback x1 mismatch"

    # tiny non-aligned shapes exercise the wrapper padding / slicing path
    b2, l2, a2, ls2 = 10, 16, 16, [32, 48]
    w1z2, w1c2, b12, w32, b32 = init_generator_params(kp, l2, a2, ls2)
    z2 = jax.random.normal(kz, (b2, l2), jnp.float32)
    c2 = jax.random.normal(kc, (b2, a2), jnp.float32)
    x2, x12 = generator_forward(z2, c2, w1z2, w1c2, b12, w32, b32)
    jax.block_until_ready((x2, x12))
    x2_ref, x12_ref = _ref_forward(z2, c2, w1z2, w1c2, b12, w32, b32)
    assert jnp.allclose(x2, x2_ref, atol=1e-3, rtol=1e-3), "padded x mismatch"
    assert jnp.allclose(x12, x12_ref, atol=1e-3, rtol=1e-3), "padded x1 mismatch"

    print("KERNEL_OK")
</pallas_src>

<mosaic_0001>
module attributes {stable_mosaic.version = 11 : i64} {
  func.func @_gen_kernel(%arg0: i32, %arg1: memref<256x128xf32, #tpu.memory_space<vmem>>, %arg2: memref<256x128xf32, #tpu.memory_space<vmem>>, %arg3: memref<128x256xbf16, #tpu.memory_space<vmem>>, %arg4: memref<128x256xbf16, #tpu.memory_space<vmem>>, %arg5: memref<1x256xf32, #tpu.memory_space<vmem>>, %arg6: memref<256x256xbf16, #tpu.memory_space<vmem>>, %arg7: memref<1x256xf32, #tpu.memory_space<vmem>>, %arg8: memref<256x256xf32, #tpu.memory_space<vmem>>, %arg9: memref<256x256xf32, #tpu.memory_space<vmem>>) attributes {dimension_semantics = [#tpu.dimension_semantics<parallel>], iteration_bounds = array<i64: 1>, scalar_prefetch = 0 : i64, scratch_operands = 0 : i64, tpu.core_type = #tpu.core_type<tc>, window_params = [{transform_indices = @transform_0, window_bounds = array<i64: 256, 128>}, {transform_indices = @transform_1, window_bounds = array<i64: 256, 128>}, {pipeline_mode = #tpu.pipeline_mode<synchronous>, transform_indices = @transform_2, window_bounds = array<i64: 128, 256>}, {pipeline_mode = #tpu.pipeline_mode<synchronous>, transform_indices = @transform_3, window_bounds = array<i64: 128, 256>}, {pipeline_mode = #tpu.pipeline_mode<synchronous>, transform_indices = @transform_4, window_bounds = array<i64: 1, 256>}, {pipeline_mode = #tpu.pipeline_mode<synchronous>, transform_indices = @transform_5, window_bounds = array<i64: 256, 256>}, {pipeline_mode = #tpu.pipeline_mode<synchronous>, transform_indices = @transform_6, window_bounds = array<i64: 1, 256>}, {transform_indices = @transform_7, window_bounds = array<i64: 256, 256>}, {transform_indices = @transform_8, window_bounds = array<i64: 256, 256>}]} {
    %c0 = arith.constant 0 : index
    %c0_0 = arith.constant 0 : index
    %0 = vector.load %arg1[%c0, %c0_0] : memref<256x128xf32, #tpu.memory_space<vmem>>, vector<256x128xf32>
    %1 = arith.truncf %0 : vector<256x128xf32> to vector<256x128xbf16>
    %c0_1 = arith.constant 0 : index
    %c0_2 = arith.constant 0 : index
    %2 = vector.load %arg3[%c0_1, %c0_2] : memref<128x256xbf16, #tpu.memory_space<vmem>>, vector<128x256xbf16>
    %cst = arith.constant dense<0.000000e+00> : vector<256x256xf32>
    %3 = tpu.matmul %1, %2, %cst {dimension_numbers = #tpu.dot_dimension_numbers<[1], [0], [0], [1], [0, 0, 1, 1], [], []>} : vector<256x128xbf16>, vector<128x256xbf16>, vector<256x256xf32> -> vector<256x256xf32>
    %c0_3 = arith.constant 0 : index
    %c0_4 = arith.constant 0 : index
    %4 = vector.load %arg2[%c0_3, %c0_4] : memref<256x128xf32, #tpu.memory_space<vmem>>, vector<256x128xf32>
    %5 = arith.truncf %4 : vector<256x128xf32> to vector<256x128xbf16>
    %c0_5 = arith.constant 0 : index
    %c0_6 = arith.constant 0 : index
    %6 = vector.load %arg4[%c0_5, %c0_6] : memref<128x256xbf16, #tpu.memory_space<vmem>>, vector<128x256xbf16>
    %cst_7 = arith.constant dense<0.000000e+00> : vector<256x256xf32>
    %7 = tpu.matmul %5, %6, %cst_7 {dimension_numbers = #tpu.dot_dimension_numbers<[1], [0], [0], [1], [0, 0, 1, 1], [], []>} : vector<256x128xbf16>, vector<128x256xbf16>, vector<256x256xf32> -> vector<256x256xf32>
    %8 = arith.addf %3, %7 : vector<256x256xf32>
    %c0_8 = arith.constant 0 : index
    %c0_9 = arith.constant 0 : index
    %9 = vector.load %arg5[%c0_8, %c0_9] : memref<1x256xf32, #tpu.memory_space<vmem>>, vector<1x256xf32>
    %10 = vector.broadcast %9 : vector<1x256xf32> to vector<256x256xf32>
    %11 = arith.addf %8, %10 : vector<256x256xf32>
    %cst_10 = arith.constant 0.000000e+00 : f32
    %12 = vector.broadcast %cst_10 : f32 to vector<256x256xf32>
    %13 = arith.cmpf ogt, %11, %12 : vector<256x256xf32>
    %cst_11 = arith.constant 2.000000e-01 : f32
    %14 = vector.broadcast %cst_11 : f32 to vector<256x256xf32>
    %15 = arith.mulf %14, %11 : vector<256x256xf32>
    %16 = arith.select %13, %11, %15 : vector<256x256xi1>, vector<256x256xf32>
    %c0_12 = arith.constant 0 : index
    %c0_13 = arith.constant 0 : index
    %17 = vector.load %arg9[%c0_12, %c0_13] : memref<256x256xf32, #tpu.memory_space<vmem>>, vector<256x256xf32>
    tpu.vector_store %arg9[%c0_12, %c0_13], %16 {strides = array<i32>} : memref<256x256xf32, #tpu.memory_space<vmem>>, vector<256x256xf32>,
    %18 = arith.truncf %16 : vector<256x256xf32> to vector<256x256xbf16>
    %c0_14 = arith.constant 0 : index
    %c0_15 = arith.constant 0 : index
    %19 = vector.load %arg6[%c0_14, %c0_15] : memref<256x256xbf16, #tpu.memory_space<vmem>>, vector<256x256xbf16>
    %cst_16 = arith.constant dense<0.000000e+00> : vector<256x256xf32>
    %20 = tpu.matmul %18, %19, %cst_16 {dimension_numbers = #tpu.dot_dimension_numbers<[1], [0], [0], [1], [0, 0, 1, 1], [], []>} : vector<256x256xbf16>, vector<256x256xbf16>, vector<256x256xf32> -> vector<256x256xf32>
    %c0_17 = arith.constant 0 : index
    %c0_18 = arith.constant 0 : index
    %21 = vector.load %arg7[%c0_17, %c0_18] : memref<1x256xf32, #tpu.memory_space<vmem>>, vector<1x256xf32>
    %22 = vector.broadcast %21 : vector<1x256xf32> to vector<256x256xf32>
    %23 = arith.addf %20, %22 : vector<256x256xf32>
    %c0_19 = arith.constant 0 : index
    %c0_20 = arith.constant 0 : index
    %24 = vector.load %arg8[%c0_19, %c0_20] : memref<256x256xf32, #tpu.memory_space<vmem>>, vector<256x256xf32>
    tpu.vector_store %arg8[%c0_19, %c0_20], %23 {strides = array<i32>} : memref<256x256xf32, #tpu.memory_space<vmem>>, vector<256x256xf32>,
    return
  }
  func.func @transform_0(%arg0: i32) -> (i32, i32) {
    %c0_i32 = arith.constant 0 : i32
    %c0_i32_0 = arith.constant 0 : i32
    return %arg0, %c0_i32 : i32, i32
  }
  func.func @transform_1(%arg0: i32) -> (i32, i32) {
    %c0_i32 = arith.constant 0 : i32
    %c0_i32_0 = arith.constant 0 : i32
    return %arg0, %c0_i32 : i32, i32
  }
  func.func @transform_2(%arg0: i32) -> (i32, i32) {
    %c0_i32 = arith.constant 0 : i32
    %c0_i32_0 = arith.constant 0 : i32
    %c0_i32_1 = arith.constant 0 : i32
    return %c0_i32, %c0_i32_0 : i32, i32
  }
  func.func @transform_3(%arg0: i32) -> (i32, i32) {
    %c0_i32 = arith.constant 0 : i32
    %c0_i32_0 = arith.constant 0 : i32
    %c0_i32_1 = arith.constant 0 : i32
    return %c0_i32, %c0_i32_0 : i32, i32
  }
  func.func @transform_4(%arg0: i32) -> (i32, i32) {
    %c0_i32 = arith.constant 0 : i32
    %c0_i32_0 = arith.constant 0 : i32
    %c0_i32_1 = arith.constant 0 : i32
    return %c0_i32, %c0_i32_0 : i32, i32
  }
  func.func @transform_5(%arg0: i32) -> (i32, i32) {
    %c0_i32 = arith.constant 0 : i32
    %c0_i32_0 = arith.constant 0 : i32
    %c0_i32_1 = arith.constant 0 : i32
    return %c0_i32, %c0_i32_0 : i32, i32
  }
  func.func @transform_6(%arg0: i32) -> (i32, i32) {
    %c0_i32 = arith.constant 0 : i32
    %c0_i32_0 = arith.constant 0 : i32
    %c0_i32_1 = arith.constant 0 : i32
    return %c0_i32, %c0_i32_0 : i32, i32
  }
  func.func @transform_7(%arg0: i32) -> (i32, i32) {
    %c0_i32 = arith.constant 0 : i32
    %c0_i32_0 = arith.constant 0 : i32
    return %arg0, %c0_i32 : i32, i32
  }
  func.func @transform_8(%arg0: i32) -> (i32, i32) {
    %c0_i32 = arith.constant 0 : i32
    %c0_i32_0 = arith.constant 0 : i32
    return %arg0, %c0_i32 : i32, i32
  }
}

</mosaic_0001>

<bundles_post_ra>
// kernel: generator_forward.1
= control target key start
LH: loop header
LB: loop body
LE: loop exit
PB: predicated region body
PF: predicated region fallthrough
CT: control target
= control target key end

     0   :  { %14 = vsyncpa [#allocation3], 0  ;;  %s2507_s0 = inlined_call_operand.hbm [shape: f32[256,128], index: 0, kind: input, shape index: {}]   ;;  %s2508_s1 = inlined_call_operand.hbm [shape: f32[256,128], index: 1, kind: input, shape index: {}]   ;;  %s2509_s2 = inlined_call_operand.hbm [shape: bf16[128,256], index: 2, kind: input, shape index: {}]   ;;  %s2510_s3 = inlined_call_operand.hbm [shape: bf16[128,256], index: 3, kind: input, shape index: {}]   ;;  %s2511_s4 = inlined_call_operand.vmem [shape: f32[1,256], index: 4, kind: input, shape index: {}]   ;;  %s2512_s5 = inlined_call_operand.hbm [shape: bf16[256,256], index: 5, kind: input, shape index: {}]   ;;  %s2513_s6 = inlined_call_operand.vmem [shape: f32[1,256], index: 6, kind: input, shape index: {}]   ;;  %s2514_s7 = inlined_call_operand.hbm [shape: f32[256,256], index: 7, kind: output, shape index: {0}]   ;;  %s2515_s8 = inlined_call_operand.hbm [shape: f32[256,256], index: 8, kind: output, shape index: {1}]  }
   0x1   :  { %15 = vsyncpa [#allocation6], 0 }
   0x2   :  { %16 = vsyncpa [#allocation9], 0 }
   0x3   :  { %17 = vsyncpa [#allocation4], 0 }
   0x4   :  { %18 = vsyncpa [#allocation13], 0  ;;  %s2049_s27 = smov [#allocation5]   ;;  %s2050_s29 = smov [#allocation8]  }
   0x5   :  { %s36_s28 = sshll.u32 %s2049_s27, 4  ;;  %s60_s30 = sshll.u32 %s2050_s29, 4  ;;  %s37_s28 = int_to_ptr.vmem [resolvable:$true] %s36_s28  ;;  %s2106_s30 = int_to_ptr.vmem [resolvable:$true] %s60_s30 }
   0x6   :  { %s1885_s11 = scalar_lea.hbm %s2508_s1, 4096 }
   0x7   :  { %p1886_p0 = scmp.ne.s32.totalorder %s2508_s1, %s1885_s11  ;;  %p1889_p1 = scmp.lt.u32.totalorder %s1885_s11, %s2508_s1 }
   0x9   :  { %p1891_p2 = pnand %p1889_p1, %p1886_p0 }
   0xb   :  { %1894 = shalt.err (!%p1891_p2)
}
   0xc   :  { %s1895_s16 = scalar_lea.vmem %s37_s28, 4096  ;;  %p1900_p4 = scmp.lt.s32.totalorder %s37_s28, %s37_s28 }
   0xd   :  { %p1896_p3 = scmp.ne.s32.totalorder %s37_s28, %s1895_s16  ;;  %p1901_p5 = scmp.lt.s32.totalorder %s1895_s16, %s1895_s16 }
   0xf   :  { %p1902_p6 = por %p1901_p5, %p1900_p4 }
  0x11   :  { %p1903_p7 = pnand %p1902_p6, %p1896_p3 }
  0x13   :  { %1906 = shalt.err (!%p1903_p7)
}
  0x14   :  { %s2051_s17 = smov 128   ;;  %s2052_s18 = smov 8  }
  0x15   :  { %42 = dma.hbm_to_vmem [thread:$0]  %s2508_s1, 4096, %s37_s28, [#allocation6], %s2051_s17, %s2051_s17, %s2052_s18  }
  0x16   :  { %s1907_s23 = scalar_lea.hbm %s2510_s3, 2048 }
  0x17   :  { %p1908_p8 = scmp.ne.s32.totalorder %s2510_s3, %s1907_s23  ;;  %p1911_p9 = scmp.lt.u32.totalorder %s1907_s23, %s2510_s3 }
  0x19   :  { %p1913_p10 = pnand %p1911_p9, %p1908_p8 }
  0x1b   :  { %1916 = shalt.err (!%p1913_p10)
}
  0x1c   :  { %s1917_s29 = scalar_lea.vmem %s2106_s30, 2048  ;;  %p1922_p12 = scmp.lt.s32.totalorder %s2106_s30, %s2106_s30 }
  0x1d   :  { %p1918_p11 = scmp.ne.s32.totalorder %s2106_s30, %s1917_s29  ;;  %p1923_p13 = scmp.lt.s32.totalorder %s1917_s29, %s1917_s29 }
  0x1f   :  { %p1924_p0 = por %p1923_p13, %p1922_p12 }
  0x21   :  { %p1925_p1 = pnand %p1924_p0, %p1918_p11 }
  0x23   :  { %1928 = shalt.err (!%p1925_p1)
}
  0x24   :  { %66 = dma.hbm_to_vmem [thread:$0]  %s2510_s3, 2048, %s2106_s30, [#allocation9], %s2051_s17, %s2051_s17, %s2052_s18  }
  0x25   :  { %s2053_s9 = smov [#allocation2]   ;;  %s2054_s11 = smov [#allocation7]  }
  0x26   :  { %s24_s10 = sshll.u32 %s2053_s9, 4  ;;  %s48_s12 = sshll.u32 %s2054_s11, 4  ;;  %s25_s10 = int_to_ptr.vmem [resolvable:$true] %s24_s10  ;;  %s2143_s12 = int_to_ptr.vmem [resolvable:$true] %s48_s12 }
  0x27   :  { %s1929_s15 = scalar_lea.hbm %s2507_s0, 4096 }
  0x28   :  { %p1930_p2 = scmp.ne.s32.totalorder %s2507_s0, %s1929_s15  ;;  %p1933_p3 = scmp.lt.u32.totalorder %s1929_s15, %s2507_s0 }
  0x2a   :  { %p1935_p4 = pnand %p1933_p3, %p1930_p2 }
  0x2c   :  { %1938 = shalt.err (!%p1935_p4)
}
  0x2d   :  { %s1939_s3 = scalar_lea.vmem %s25_s10, 4096  ;;  %p1944_p6 = scmp.lt.s32.totalorder %s25_s10, %s25_s10 }
  0x2e   :  { %p1940_p5 = scmp.ne.s32.totalorder %s25_s10, %s1939_s3  ;;  %p1945_p7 = scmp.lt.s32.totalorder %s1939_s3, %s1939_s3 }
  0x30   :  { %p1946_p8 = por %p1945_p7, %p1944_p6 }
  0x32   :  { %p1947_p9 = pnand %p1946_p8, %p1940_p5 }
  0x34   :  { %1950 = shalt.err (!%p1947_p9)
}
  0x35   :  { %30 = dma.hbm_to_vmem [thread:$0]  %s2507_s0, 4096, %s25_s10, [#allocation3], %s2051_s17, %s2051_s17, %s2052_s18  }
  0x36   :  { %s1951_s25 = scalar_lea.hbm %s2509_s2, 2048 }
  0x37   :  { %p1952_p10 = scmp.ne.s32.totalorder %s2509_s2, %s1951_s25  ;;  %p1955_p11 = scmp.lt.u32.totalorder %s1951_s25, %s2509_s2 }
  0x39   :  { %p1957_p12 = pnand %p1955_p11, %p1952_p10 }
  0x3b   :  { %1960 = shalt.err (!%p1957_p12)
}
  0x3c   :  { %s1961_s28 = scalar_lea.vmem %s2143_s12, 2048  ;;  %p1966_p0 = scmp.lt.s32.totalorder %s2143_s12, %s2143_s12 }
  0x3d   :  { %p1962_p13 = scmp.ne.s32.totalorder %s2143_s12, %s1961_s28  ;;  %p1967_p1 = scmp.lt.s32.totalorder %s1961_s28, %s1961_s28 }
  0x3f   :  { %p1968_p2 = por %p1967_p1, %p1966_p0 }
  0x41   :  { %p1969_p3 = pnand %p1968_p2, %p1962_p13 }
  0x43   :  { %1972 = shalt.err (!%p1969_p3)
}
  0x44   :  { %54 = dma.hbm_to_vmem [thread:$0]  %s2509_s2, 2048, %s2143_s12, [#allocation6], %s2051_s17, %s2051_s17, %s2052_s18  }
  0x45   :  { %s2055_s10 = smov [#allocation10]   ;;  %s1973_s15 = scalar_lea.hbm %s2512_s5, 4096 }
  0x46   :  { %s74_s11 = sshll.u32 %s2055_s10, 4  ;;  %p1974_p4 = scmp.ne.s32.totalorder %s2512_s5, %s1973_s15  ;;  %s75_s11 = int_to_ptr.vmem [resolvable:$true] %s74_s11 }
  0x47   :  { %p1977_p5 = scmp.lt.u32.totalorder %s1973_s15, %s2512_s5 }
  0x49   :  { %p1979_p6 = pnand %p1977_p5, %p1974_p4 }
  0x4b   :  { %1982 = shalt.err (!%p1979_p6)
}
  0x4c   :  { %s1983_s3 = scalar_lea.vmem %s75_s11, 4096  ;;  %p1988_p8 = scmp.lt.s32.totalorder %s75_s11, %s75_s11 }
  0x4d   :  { %p1984_p7 = scmp.ne.s32.totalorder %s75_s11, %s1983_s3  ;;  %p1989_p9 = scmp.lt.s32.totalorder %s1983_s3, %s1983_s3 }
  0x4f   :  { %p1990_p10 = por %p1989_p9, %p1988_p8 }
  0x51   :  { %p1991_p11 = pnand %p1990_p10, %p1984_p7 }
  0x53   :  { %1994 = shalt.err (!%p1991_p11)
}
  0x54   :  { %80 = dma.hbm_to_vmem [thread:$0]  %s2512_s5, 4096, %s75_s11, [#allocation9], %s2051_s17, %s2051_s17, %s2052_s18  }
  0x55   :  { %2039 = dma.done.wait [#allocation3], 4096  }
  0x56   :  { %2040 = vsyncadd [#allocation3], 4294963200 }
  0x57   :  { %2041 = dma.done.wait [#allocation6], 6144  }
  0x58   :  { %2042 = vsyncadd [#allocation6], 4294961152 }
  0x59   :  { %2043 = dma.done.wait [#allocation9], 6144  }
  0x5a   :  { %2044 = vsyncadd [#allocation9], 4294961152  ;;  %v2056_v0 = vmov 0   ;;  %v1789_v1 = vld [vmem:[#allocation8 + $0x4] ss:$8 sps:$4 sm:$0xff]   ;;  %v165_v25 = vld [vmem:[#allocation5 + $0x10] sm:$0xff] }
  0x5b   :  { %339 = vmatprep.mubr.bf16.mxu0 %v2056_v0  ;;  %419 = vmatprep.mubr.bf16.mxu1 %v2056_v0  ;;  %v1791_v2 = vld [vmem:[#allocation8] ss:$8 sps:$4 sm:$0xff]   ;;  %v1792_v3 = vld [vmem:[#allocation8 + $0x14] ss:$8 sps:$4 sm:$0xff]   ;;  %v1794_v4 = vld [vmem:[#allocation8 + $0x10] ss:$8 sps:$4 sm:$0xff]  }
  0x5c   :  { %307 = vmatprep.subr.bf16.mxu0 %v1789_v1  ;;  %1697 = vmatprep.subr.bf16.mxu1 %v1789_v1  ;;  %v1795_v5 = vld [vmem:[#allocation8 + $0x24] ss:$8 sps:$4 sm:$0xff]   ;;  %v1797_v6 = vld [vmem:[#allocation8 + $0x20] ss:$8 sps:$4 sm:$0xff]   ;;  %v1798_v7 = vld [vmem:[#allocation8 + $0x34] ss:$8 sps:$4 sm:$0xff]  }
  0x5d   :  { %308 = vmatpush1.bf16.msra.mxu0 %v1791_v2  ;;  %1705 = vmatpush1.bf16.msra.mxu1 %v1791_v2  ;;  %v1800_v8 = vld [vmem:[#allocation8 + $0x30] ss:$8 sps:$4 sm:$0xff]   ;;  %v1801_v9 = vld [vmem:[#allocation8 + $0x44] ss:$8 sps:$4 sm:$0xff]   ;;  %v1803_v10 = vld [vmem:[#allocation8 + $0x40] ss:$8 sps:$4 sm:$0xff]  }
  0x5e   :  { %309 = vmatprep.subr.bf16.mxu0 %v1792_v3  ;;  %1698 = vmatprep.subr.bf16.mxu1 %v1792_v3  ;;  %v1804_v11 = vld [vmem:[#allocation8 + $0x54] ss:$8 sps:$4 sm:$0xff]   ;;  %v1806_v12 = vld [vmem:[#allocation8 + $0x50] ss:$8 sps:$4 sm:$0xff]   ;;  %v1807_v13 = vld [vmem:[#allocation8 + $0x64] ss:$8 sps:$4 sm:$0xff]  }
  0x5f   :  { %v1809_v14 = vld [vmem:[#allocation8 + $0x60] ss:$8 sps:$4 sm:$0xff]   ;;  %v1810_v15 = vld [vmem:[#allocation8 + $0x74] ss:$8 sps:$4 sm:$0xff]   ;;  %v1812_v16 = vld [vmem:[#allocation8 + $0x70] ss:$8 sps:$4 sm:$0xff]  }
  0x60   :  { %v163_v17 = vld [vmem:[#allocation5] sm:$0xff]  ;;  %v164_v18 = vld [vmem:[#allocation5 + $0x8] sm:$0xff]  ;;  %v1818_v22 = vld [vmem:[#allocation7 + $0x14] ss:$8 sps:$4 sm:$0xff]   ;;  %s2057_s30 = smov [#allocation12]  }
  0x61   :  { %310 = vmatpush1.bf16.msra.mxu0 %v1794_v4  ;;  %1706 = vmatpush1.bf16.msra.mxu1 %v1794_v4  ;;  %v1815_v19 = vld [vmem:[#allocation7 + $0x4] ss:$8 sps:$4 sm:$0xff]   ;;  %v195_v20 = vpack.c.bf16 %v164_v18, %v163_v17  ;;  %v1813_v21 = vld [vmem:[#allocation7] ss:$8 sps:$4 sm:$0xff]   ;;  %v166_v26 = vld [vmem:[#allocation5 + $0x18] sm:$0xff]  ;;  %s1615_s22 = sshll.u32 %s2057_s30, 4  ;;  %s1616_s22 = int_to_ptr.vmem [resolvable:$true] %s1615_s22 }
  0x62   :  { %311 = vmatprep.subr.bf16.mxu0 %v1795_v5  ;;  %1699 = vmatprep.subr.bf16.mxu1 %v1795_v5  ;;  %v179_v23 = vld [vmem:[#allocation5 + $0x80] sm:$0xff]  ;;  %v180_v24 = vld [vmem:[#allocation5 + $0x88] sm:$0xff]  ;;  %v1816_v28 = vld [vmem:[#allocation7 + $0x10] ss:$8 sps:$4 sm:$0xff]   ;;  %v196_v33 = vpack.c.bf16 %v166_v26, %v165_v25  ;;  %s1995_s23 = scalar_lea.vmem %s1616_s22, 8192  ;;  %p2000_p13 = scmp.lt.s32.totalorder %s1616_s22, %s1616_s22 }
  0x63   :  { %v203_v27 = vpack.c.bf16 %v180_v24, %v179_v23  ;;  %v1821_v29 = vld [vmem:[#allocation7 + $0x24] ss:$8 sps:$4 sm:$0xff]   ;;  %v181_v30 = vld [vmem:[#allocation5 + $0x90] sm:$0xff]  ;;  %v182_v31 = vld [vmem:[#allocation5 + $0x98] sm:$0xff]  ;;  %p1996_p12 = scmp.ne.s32.totalorder %s1616_s22, %s1995_s23  ;;  %p2001_p0 = scmp.lt.s32.totalorder %s1995_s23, %s1995_s23 }
  0x64   :  { %v1819_v32 = vld [vmem:[#allocation7 + $0x20] ss:$8 sps:$4 sm:$0xff]   ;;  %v1824_v34 = vld [vmem:[#allocation7 + $0x34] ss:$8 sps:$4 sm:$0xff]   ;;  %v204_v35 = vpack.c.bf16 %v182_v31, %v181_v30  ;;  %v1822_v38 = vld [vmem:[#allocation7 + $0x30] ss:$8 sps:$4 sm:$0xff]  }
  0x65   :  { %312 = vmatpush1.bf16.msra.mxu0 %v1797_v6  ;;  %1707 = vmatpush1.bf16.msra.mxu1 %v1797_v6  ;;  %v167_v36 = vld [vmem:[#allocation5 + $0x20] sm:$0xff]  ;;  %v168_v37 = vld [vmem:[#allocation5 + $0x28] sm:$0xff]  ;;  %v1830_v44 = vld [vmem:[#allocation7 + $0x54] ss:$8 sps:$4 sm:$0xff]   ;;  %p2002_p1 = por %p2001_p0, %p2000_p13 }
  0x66   :  { %313 = vmatprep.subr.bf16.mxu0 %v1798_v7  ;;  %1700 = vmatprep.subr.bf16.mxu1 %v1798_v7  ;;  %v1827_v39 = vld [vmem:[#allocation7 + $0x44] ss:$8 sps:$4 sm:$0xff]   ;;  %v197_v42 = vpack.c.bf16 %v168_v37, %v167_v36  ;;  %v1825_v43 = vld [vmem:[#allocation7 + $0x40] ss:$8 sps:$4 sm:$0xff]   ;;  %v169_v46 = vld [vmem:[#allocation5 + $0x30] sm:$0xff] }
  0x67   :  { %v183_v40 = vld [vmem:[#allocation5 + $0xa0] sm:$0xff]  ;;  %v184_v41 = vld [vmem:[#allocation5 + $0xa8] sm:$0xff]  ;;  %v170_v47 = vld [vmem:[#allocation5 + $0x38] sm:$0xff]  ;;  %p2003_p2 = pnand %p2002_p1, %p1996_p12 }
  0x68   :  { %v205_v45 = vpack.c.bf16 %v184_v41, %v183_v40  ;;  %v1828_v48 = vld [vmem:[#allocation7 + $0x50] ss:$8 sps:$4 sm:$0xff]   ;;  %v1833_v49 = vld [vmem:[#allocation7 + $0x64] ss:$8 sps:$4 sm:$0xff]   ;;  %v198_v52 = vpack.c.bf16 %v170_v47, %v169_v46  ;;  %v1831_v53 = vld [vmem:[#allocation7 + $0x60] ss:$8 sps:$4 sm:$0xff]  }
  0x69   :  { %314 = vmatpush1.bf16.msra.mxu0 %v1800_v8  ;;  %1708 = vmatpush1.bf16.msra.mxu1 %v1800_v8  ;;  %v185_v50 = vld [vmem:[#allocation5 + $0xb0] sm:$0xff]  ;;  %v186_v51 = vld [vmem:[#allocation5 + $0xb8] sm:$0xff]  ;;  %v171_v56 = vld [vmem:[#allocation5 + $0x40] sm:$0xff] }
  0x6a   :  { %315 = vmatprep.subr.bf16.mxu0 %v1801_v9  ;;  %1701 = vmatprep.subr.bf16.mxu1 %v1801_v9  ;;  %v1836_v54 = vld [vmem:[#allocation7 + $0x74] ss:$8 sps:$4 sm:$0xff]   ;;  %v206_v55 = vpack.c.bf16 %v186_v51, %v185_v50  ;;  %v172_v57 = vld [vmem:[#allocation5 + $0x48] sm:$0xff]  ;;  %v1834_v58 = vld [vmem:[#allocation7 + $0x70] ss:$8 sps:$4 sm:$0xff]  }
  0x6b   :  { %v187_v59 = vld [vmem:[#allocation5 + $0xc0] sm:$0xff]  ;;  %v188_v60 = vld [vmem:[#allocation5 + $0xc8] sm:$0xff]  ;;  %v199_v61 = vpack.c.bf16 %v172_v57, %v171_v56  ;;  %v173_v63 = vld [vmem:[#allocation5 + $0x50] sm:$0xff] }
  0x6c   :  { %v207_v62 = vpack.c.bf16 %v188_v60, %v187_v59  ;;  %v174_v1 = vld [vmem:[#allocation5 + $0x58] sm:$0xff]  ;;  %v189_v2 = vld [vmem:[#allocation5 + $0xd0] sm:$0xff]  ;;  %v175_v6 = vld [vmem:[#allocation5 + $0x60] sm:$0xff] }
  0x6d   :  { %316 = vmatpush1.bf16.msra.mxu0 %v1803_v10  ;;  %1709 = vmatpush1.bf16.msra.mxu1 %v1803_v10  ;;  %v190_v3 = vld [vmem:[#allocation5 + $0xd8] sm:$0xff]  ;;  %v200_v4 = vpack.c.bf16 %v174_v1, %v173_v63  ;;  %v176_v7 = vld [vmem:[#allocation5 + $0x68] sm:$0xff]  ;;  %v191_v8 = vld [vmem:[#allocation5 + $0xe0] sm:$0xff] }
  0x6e   :  { %317 = vmatprep.subr.bf16.mxu0 %v1804_v11  ;;  %1702 = vmatprep.subr.bf16.mxu1 %v1804_v11  ;;  %v208_v5 = vpack.c.bf16 %v190_v3, %v189_v2  ;;  %v192_v9 = vld [vmem:[#allocation5 + $0xe8] sm:$0xff]  ;;  %v201_v10 = vpack.c.bf16 %v176_v7, %v175_v6  ;;  %v1840_v23 = vld [vmem:[#allocation10 + $0x10] ss:$8 sps:$4 sm:$0xff]   ;;  %v1860_v41 = vld [vmem:[#allocation10 + $0x74] ss:$8 sps:$4 sm:$0xff]  }
  0x6f   :  { %v209_v11 = vpack.c.bf16 %v192_v9, %v191_v8  ;;  %v1837_v18 = vld [vmem:[#allocation10] ss:$8 sps:$4 sm:$0xff]   ;;  %v1845_v25 = vld [vmem:[#allocation10 + $0x24] ss:$8 sps:$4 sm:$0xff]   ;;  %v1846_v30 = vld [vmem:[#allocation10 + $0x30] ss:$8 sps:$4 sm:$0xff]  }
  0x70   :  { %v1843_v26 = vld [vmem:[#allocation10 + $0x20] ss:$8 sps:$4 sm:$0xff]   ;;  %v1852_v37 = vld [vmem:[#allocation10 + $0x50] ss:$8 sps:$4 sm:$0xff]   ;;  %v1863_v46 = vld [vmem:[#allocation10 + $0x84] ss:$8 sps:$4 sm:$0xff]  }
  0x71   :  { %318 = vmatpush1.bf16.msra.mxu0 %v1806_v12  ;;  %1710 = vmatpush1.bf16.msra.mxu1 %v1806_v12  ;;  %v177_v12 = vld [vmem:[#allocation5 + $0x70] sm:$0xff]  ;;  %v104_v36 = vld [vmem:[#allocation2 + $0x28] sm:$0xff]  ;;  %v110_v57 = vld [vmem:[#allocation2 + $0x58] sm:$0xff] }
  0x72   :  { %319 = vmatprep.subr.bf16.mxu0 %v1807_v13  ;;  %1703 = vmatprep.subr.bf16.mxu1 %v1807_v13  ;;  %v178_v13 = vld [vmem:[#allocation5 + $0x78] sm:$0xff]  ;;  %v1855_v40 = vld [vmem:[#allocation10 + $0x60] ss:$8 sps:$4 sm:$0xff]   ;;  %v109_v56 = vld [vmem:[#allocation2 + $0x50] sm:$0xff] }
  0x73   :  { %v1861_v47 = vld [vmem:[#allocation10 + $0x80] ss:$8 sps:$4 sm:$0xff]   ;;  %v1864_v51 = vld [vmem:[#allocation10 + $0x90] ss:$8 sps:$4 sm:$0xff]   ;;  %v136_v59 = vpack.c.bf16 %v110_v57, %v109_v56  ;;  %v1875_v60 = vld [vmem:[#allocation10 + $0xc4] ss:$8 sps:$4 sm:$0xff]  }
  0x74   :  { %v108_v50 = vld [vmem:[#allocation2 + $0x48] sm:$0xff]  ;;  %v113_v2 = vld [vmem:[#allocation2 + $0x70] sm:$0xff]  ;;  %v114_v3 = vld [vmem:[#allocation2 + $0x78] sm:$0xff] }
  0x75   :  { %320 = vmatpush1.bf16.msra.mxu0 %v1809_v14  ;;  %1711 = vmatpush1.bf16.msra.mxu1 %v1809_v14  ;;  %v193_v14 = vld [vmem:[#allocation5 + $0xf0] sm:$0xff]  ;;  %v112_v63 = vld [vmem:[#allocation2 + $0x68] sm:$0xff]  ;;  %v118_v9 = vld [vmem:[#allocation2 + $0x98] sm:$0xff] }
  0x76   :  { %321 = vmatprep.subr.bf16.mxu0 %v1810_v15  ;;  %1704 = vmatprep.subr.bf16.mxu1 %v1810_v15  ;;  %v194_v15 = vld [vmem:[#allocation5 + $0xf8] sm:$0xff]  ;;  %v116_v6 = vld [vmem:[#allocation2 + $0x88] sm:$0xff]  ;;  %v117_v8 = vld [vmem:[#allocation2 + $0x90] sm:$0xff] }
  0x77   :  { %v210_v17 = vpack.c.bf16 %v194_v15, %v193_v14  ;;  %v121_v14 = vld [vmem:[#allocation2 + $0xb0] sm:$0xff]  ;;  %v122_v15 = vld [vmem:[#allocation2 + $0xb8] sm:$0xff] }
  0x79   :  { %322 = vmatpush1.bf16.msra.mxu0 %v1812_v16  ;;  %1712 = vmatpush1.bf16.msra.mxu1 %v1812_v16  ;;  %v202_v16 = vpack.c.bf16 %v178_v13, %v177_v12  ;;  %v120_v12 = vld [vmem:[#allocation2 + $0xa8] sm:$0xff] }
  0x7a   :  { %580 = vmatprep.subr.bf16.mxu0 %v1815_v19  ;;  %v1839_v19 = vld [vmem:[#allocation10 + $0x4] ss:$8 sps:$4 sm:$0xff]  }
  0x7b   :  { %1341 = vmatprep.subr.bf16.mxu1 %v1839_v19  ;;  %v1881_v19 = vld [vmem:[#allocation10 + $0xe4] ss:$8 sps:$4 sm:$0xff]  }
  0x7c   :  { %340 = vmatmul.mubr.bf16.vlgmr.msra.gmra.mrb[0].mxu0 %v195_v20  ;;  %420 = vmatmul.mubr.bf16.vlgmr.msra.gmra.mrb[0].mxu1 %v203_v27  ;;  %v99_v20 = vld [vmem:[#allocation2] sm:$0xff]  ;;  %v1848_v27 = vld [vmem:[#allocation10 + $0x34] ss:$8 sps:$4 sm:$0xff]  }
  0x7d   :  { %581 = vmatpush1.bf16.msra.mxu0 %v1813_v21  ;;  %349 = vmatprep.mubr.bf16.mxu0 %v2056_v0  ;;  %v100_v21 = vld [vmem:[#allocation2 + $0x8] sm:$0xff] }
  0x7e   :  { %582 = vmatprep.subr.bf16.mxu0 %v1818_v22  ;;  %429 = vmatprep.mubr.bf16.mxu1 %v2056_v0  ;;  %v1842_v22 = vld [vmem:[#allocation10 + $0x14] ss:$8 sps:$4 sm:$0xff]   ;;  %v131_v24 = vpack.c.bf16 %v100_v21, %v99_v20  ;;  %v1879_v20 = vld [vmem:[#allocation10 + $0xe0] ss:$8 sps:$4 sm:$0xff]  }
  0x7f   :  { %1342 = vmatpush1.bf16.msra.mxu1 %v1837_v18  ;;  %v142_v18 = vpack.c.bf16 %v122_v15, %v121_v14  ;;  %v123_v21 = vld [vmem:[#allocation2 + $0xc0] sm:$0xff] }
  0x80   :  { %1343 = vmatprep.subr.bf16.mxu1 %v1842_v22  ;;  %v124_v22 = vld [vmem:[#allocation2 + $0xc8] sm:$0xff] }
  0x81   :  { %583 = vmatpush1.bf16.msra.mxu0 %v1816_v28  ;;  %v101_v28 = vld [vmem:[#allocation2 + $0x10] sm:$0xff] }
  0x82   :  { %584 = vmatprep.subr.bf16.mxu0 %v1821_v29  ;;  %v102_v29 = vld [vmem:[#allocation2 + $0x18] sm:$0xff] }
  0x83   :  { %1344 = vmatpush1.bf16.msra.mxu1 %v1840_v23  ;;  %v132_v31 = vpack.c.bf16 %v102_v29, %v101_v28  ;;  %v1884_v23 = vld [vmem:[#allocation10 + $0xf4] ss:$8 sps:$4 sm:$0xff]   ;;  %v127_v29 = vld [vmem:[#allocation2 + $0xe0] sm:$0xff] }
  0x84   :  { %350 = vmatmul.mubr.bf16.gmra.mrb[4].mxu0 %v196_v33  ;;  %430 = vmatmul.mubr.bf16.gmra.mrb[4].mxu1 %v204_v35  ;;  %v1849_v33 = vld [vmem:[#allocation10 + $0x40] ss:$8 sps:$4 sm:$0xff]  }
  0x85   :  { %359 = vmatprep.mubr.bf16.mxu0 %v2056_v0  ;;  %585 = vmatpush1.bf16.msra.mxu0 %v1819_v32  ;;  %v1851_v32 = vld [vmem:[#allocation10 + $0x44] ss:$8 sps:$4 sm:$0xff]  }
  0x86   :  { %586 = vmatprep.subr.bf16.mxu0 %v1824_v34  ;;  %439 = vmatprep.mubr.bf16.mxu1 %v2056_v0  ;;  %v1854_v34 = vld [vmem:[#allocation10 + $0x54] ss:$8 sps:$4 sm:$0xff]   ;;  %v103_v35 = vld [vmem:[#allocation2 + $0x20] sm:$0xff] }
  0x87   :  { %1345 = vmatprep.subr.bf16.mxu1 %v1845_v25  ;;  %v143_v25 = vpack.c.bf16 %v124_v22, %v123_v21 }
  0x88   :  { %1346 = vmatpush1.bf16.msra.mxu1 %v1843_v26  ;;  %v125_v26 = vld [vmem:[#allocation2 + $0xd0] sm:$0xff] }
  0x89   :  { %587 = vmatpush1.bf16.msra.mxu0 %v1822_v38  ;;  %1347 = vmatprep.subr.bf16.mxu1 %v1848_v27  ;;  %v133_v38 = vpack.c.bf16 %v104_v36, %v103_v35  ;;  %v126_v27 = vld [vmem:[#allocation2 + $0xd8] sm:$0xff] }
  0x8a   :  { %588 = vmatprep.subr.bf16.mxu0 %v1827_v39  ;;  %v1857_v39 = vld [vmem:[#allocation10 + $0x64] ss:$8 sps:$4 sm:$0xff]   ;;  %v144_v28 = vpack.c.bf16 %v126_v27, %v125_v26 }
  0x8c   :  { %360 = vmatmul.mubr.bf16.gmra.mrb[8].mxu0 %v197_v42  ;;  %440 = vmatmul.mubr.bf16.gmra.mrb[8].mxu1 %v205_v45  ;;  %v105_v42 = vld [vmem:[#allocation2 + $0x30] sm:$0xff] }
  0x8d   :  { %369 = vmatprep.mubr.bf16.mxu0 %v2056_v0  ;;  %589 = vmatpush1.bf16.msra.mxu0 %v1825_v43  ;;  %v106_v43 = vld [vmem:[#allocation2 + $0x38] sm:$0xff] }
  0x8e   :  { %590 = vmatprep.subr.bf16.mxu0 %v1830_v44  ;;  %449 = vmatprep.mubr.bf16.mxu1 %v2056_v0  ;;  %v1858_v44 = vld [vmem:[#allocation10 + $0x70] ss:$8 sps:$4 sm:$0xff]   ;;  %v134_v45 = vpack.c.bf16 %v106_v43, %v105_v42 }
  0x8f   :  { %1348 = vmatpush1.bf16.msra.mxu1 %v1846_v30  ;;  %v128_v30 = vld [vmem:[#allocation2 + $0xe8] sm:$0xff] }
  0x90   :  { %1349 = vmatprep.subr.bf16.mxu1 %v1851_v32  ;;  %v129_v32 = vld [vmem:[#allocation2 + $0xf0] sm:$0xff] }
  0x91   :  { %591 = vmatpush1.bf16.msra.mxu0 %v1828_v48  ;;  %v1866_v48 = vld [vmem:[#allocation10 + $0x94] ss:$8 sps:$4 sm:$0xff]  }
  0x92   :  { %592 = vmatprep.subr.bf16.mxu0 %v1833_v49  ;;  %v107_v49 = vld [vmem:[#allocation2 + $0x40] sm:$0xff] }
  0x93   :  { %1350 = vmatpush1.bf16.msra.mxu1 %v1849_v33  ;;  %v130_v33 = vld [vmem:[#allocation2 + $0xf8] sm:$0xff] }
  0x94   :  { %370 = vmatmul.mubr.bf16.gmra.mrb[12].mxu0 %v198_v52  ;;  %450 = vmatmul.mubr.bf16.gmra.mrb[12].mxu1 %v206_v55  ;;  %v135_v52 = vpack.c.bf16 %v108_v50, %v107_v49  ;;  %v1872_v55 = vld [vmem:[#allocation10 + $0xb4] ss:$8 sps:$4 sm:$0xff]  }
  0x95   :  { %379 = vmatprep.mubr.bf16.mxu0 %v2056_v0  ;;  %593 = vmatpush1.bf16.msra.mxu0 %v1831_v53  ;;  %v1869_v53 = vld [vmem:[#allocation10 + $0xa4] ss:$8 sps:$4 sm:$0xff]  }
  0x96   :  { %594 = vmatprep.subr.bf16.mxu0 %v1836_v54  ;;  %459 = vmatprep.mubr.bf16.mxu1 %v2056_v0  ;;  %v1867_v54 = vld [vmem:[#allocation10 + $0xa0] ss:$8 sps:$4 sm:$0xff]  }
  0x97   :  { %1351 = vmatprep.subr.bf16.mxu1 %v1854_v34  ;;  %v146_v34 = vpack.c.bf16 %v130_v33, %v129_v32 }
  0x98   :  { %1352 = vmatpush1.bf16.msra.mxu1 %v1852_v37 }
  0x99   :  { %595 = vmatpush1.bf16.msra.mxu0 %v1834_v58  ;;  %1353 = vmatprep.subr.bf16.mxu1 %v1857_v39  ;;  %v1870_v58 = vld [vmem:[#allocation10 + $0xb0] ss:$8 sps:$4 sm:$0xff]  }
  0x9c   :  { %380 = vmatmul.mubr.bf16.gmra.mrb[16].mxu0 %v199_v61  ;;  %460 = vmatmul.mubr.bf16.gmra.mrb[16].mxu1 %v207_v62  ;;  %v1873_v61 = vld [vmem:[#allocation10 + $0xc0] ss:$8 sps:$4 sm:$0xff]  }
  0x9d   :  { %389 = vmatprep.mubr.bf16.mxu0 %v2056_v0  ;;  %469 = vmatprep.mubr.bf16.mxu1 %v2056_v0  ;;  %v111_v62 = vld [vmem:[#allocation2 + $0x60] sm:$0xff] }
  0x9e   :  { %1354 = vmatpush1.bf16.msra.mxu1 %v1855_v40  ;;  %v137_v1 = vpack.c.bf16 %v112_v63, %v111_v62 }
  0x9f   :  { %1355 = vmatprep.subr.bf16.mxu1 %v1860_v41 }
  0xa2   :  { %1356 = vmatpush1.bf16.msra.mxu1 %v1858_v44 }
  0xa3   :  { %1357 = vmatprep.subr.bf16.mxu1 %v1863_v46 }
  0xa4   :  { %390 = vmatmul.mubr.bf16.gmra.mrb[20].mxu0 %v200_v4  ;;  %470 = vmatmul.mubr.bf16.gmra.mrb[20].mxu1 %v208_v5  ;;  %v138_v4 = vpack.c.bf16 %v114_v3, %v113_v2  ;;  %v115_v5 = vld [vmem:[#allocation2 + $0x80] sm:$0xff] }
  0xa5   :  { %399 = vmatprep.mubr.bf16.mxu0 %v2056_v0  ;;  %479 = vmatprep.mubr.bf16.mxu1 %v2056_v0  ;;  %v139_v7 = vpack.c.bf16 %v116_v6, %v115_v5  ;;  %v773_v2 = vld [vmem:[%s2511_s4] sm:$0x3] }
  0xa6   :  { %1358 = vmatpush1.bf16.msra.mxu1 %v1861_v47 }
  0xa7   :  { %1359 = vmatprep.subr.bf16.mxu1 %v1866_v48 }
  0xaa   :  { %1360 = vmatpush1.bf16.msra.mxu1 %v1864_v51 }
  0xab   :  { %1361 = vmatprep.subr.bf16.mxu1 %v1869_v53 }
  0xac   :  { %400 = vmatmul.mubr.bf16.gmra.mrb[24].mxu0 %v201_v10  ;;  %480 = vmatmul.mubr.bf16.gmra.mrb[24].mxu1 %v209_v11  ;;  %v140_v10 = vpack.c.bf16 %v118_v9, %v117_v8  ;;  %v119_v11 = vld [vmem:[#allocation2 + $0xa0] sm:$0xff] }
  0xad   :  { %409 = vmatprep.mubr.bf16.mxu0 %v2056_v0  ;;  %489 = vmatprep.mubr.bf16.mxu1 %v2056_v0  ;;  %v141_v13 = vpack.c.bf16 %v120_v12, %v119_v11 }
  0xae   :  { %1362 = vmatpush1.bf16.msra.mxu1 %v1867_v54 }
  0xaf   :  { %1363 = vmatprep.subr.bf16.mxu1 %v1872_v55 }
  0xb2   :  { %1364 = vmatpush1.bf16.msra.mxu1 %v1870_v58  ;;  %v775_v58 = vlaneseq }
  0xb3   :  { %1365 = vmatprep.subr.bf16.mxu1 %v1875_v60 }
  0xb4   :  { %410 = vmatmul.mubr.bf16.gmra.mrb[28].mxu0 %v202_v16  ;;  %490 = vmatmul.mubr.bf16.gmra.mrb[28].mxu1 %v210_v17  ;;  %v1878_v16 = vld [vmem:[#allocation10 + $0xd4] ss:$8 sps:$4 sm:$0xff]   ;;  %v1876_v17 = vld [vmem:[#allocation10 + $0xd0] ss:$8 sps:$4 sm:$0xff]   ;;  %v2281_v62 = vshrl.u32 %v775_v58, 7 }
  0xb5   :  { %612 = vmatprep.mubr.bf16.mxu0 %v2056_v0 }
  0xb6   :  { %1366 = vmatpush1.bf16.msra.mxu1 %v1873_v61  ;;  %v781_v3 = vsub.s32 1, %v2281_v62 }
  0xb7   :  { %1367 = vmatprep.subr.bf16.mxu1 %v1878_v16 }
  0xb8   :  { %v2304_v9 = vrot.slane %v773_v2, %v781_v3 }
  0xba   :  { %1368 = vmatpush1.bf16.msra.mxu1 %v1876_v17 }
  0xbb   :  { %1369 = vmatprep.subr.bf16.mxu1 %v1881_v19 }
  0xbc   :  { %613 = vmatmul.mubr.bf16.vlgmr.msra.gmra.mrb[0].mxu0 %v131_v24  ;;  %v1882_v24 = vld [vmem:[#allocation10 + $0xf0] ss:$8 sps:$4 sm:$0xff]  }
  0xbd   :  { %622 = vmatprep.mubr.bf16.mxu0 %v2056_v0 }
  0xbe   :  { %1370 = vmatpush1.bf16.msra.mxu1 %v1879_v20 }
  0xbf   :  { %1371 = vmatprep.subr.bf16.mxu1 %v1884_v23 }
  0xc2   :  { %1372 = vmatpush1.bf16.msra.mxu1 %v1882_v24 }
  0xc4   :  { %623 = vmatmul.mubr.bf16.gmra.mrb[4].mxu0 %v132_v31  ;;  %v145_v31 = vpack.c.bf16 %v128_v30, %v127_v29 }
  0xc5   :  { %632 = vmatprep.mubr.bf16.mxu0 %v2056_v0 }
  0xcc   :  { %633 = vmatmul.mubr.bf16.gmra.mrb[8].mxu0 %v133_v38 }
  0xcd   :  { %642 = vmatprep.mubr.bf16.mxu0 %v2056_v0 }
  0xd4   :  { %643 = vmatmul.mubr.bf16.gmra.mrb[12].mxu0 %v134_v45 }
  0xd5   :  { %652 = vmatprep.mubr.bf16.mxu0 %v2056_v0 }
  0xdc   :  { %653 = vmatmul.mubr.bf16.gmra.mrb[16].mxu0 %v135_v52 }
  0xdd   :  { %662 = vmatprep.mubr.bf16.mxu0 %v2056_v0 }
  0xe4   :  { %663 = vmatmul.mubr.bf16.gmra.mrb[20].mxu0 %v136_v59 }
  0xe5   :  { %672 = vmatprep.mubr.bf16.mxu0 %v2056_v0 }
  0xec   :  { %673 = vmatmul.mubr.bf16.gmra.mrb[24].mxu0 %v137_v1  ;;  %v777_v1 = vsub.s32 0, %v2281_v62 }
  0xed   :  { %682 = vmatprep.mubr.bf16.mxu0 %v2056_v0 }
  0xf4   :  { %683 = vmatmul.mubr.bf16.gmra.mrb[28].mxu0 %v138_v4 }
  0xf5   :  { %692 = vmatprep.mubr.bf16.mxu0 %v2056_v0 }
  0xfc   :  { %693 = vmatmul.mubr.bf16.gmra.mrb[32].mxu0 %v139_v7  ;;  %v2298_v7 = vrot.slane %v773_v2, %v777_v1 }
  0xfd   :  { %702 = vmatprep.mubr.bf16.mxu0 %v2056_v0 }
 0x104   :  { %703 = vmatmul.mubr.bf16.gmra.mrb[36].mxu0 %v140_v10 }
 0x105   :  { %712 = vmatprep.mubr.bf16.mxu0 %v2056_v0 }
 0x10c   :  { %713 = vmatmul.mubr.bf16.gmra.mrb[40].mxu0 %v141_v13 }
 0x10d   :  { %722 = vmatprep.mubr.bf16.mxu0 %v2056_v0 }
 0x114   :  { %723 = vmatmul.mubr.bf16.gmra.mrb[44].mxu0 %v142_v18 }
 0x115   :  { %732 = vmatprep.mubr.bf16.mxu0 %v2056_v0 }
 0x11c   :  { %733 = vmatmul.mubr.bf16.gmra.mrb[48].mxu0 %v143_v25 }
 0x11d   :  { %742 = vmatprep.mubr.bf16.mxu0 %v2056_v0 }
 0x124   :  { %743 = vmatmul.mubr.bf16.gmra.mrb[52].mxu0 %v144_v28 }
 0x125   :  { %752 = vmatprep.mubr.bf16.mxu0 %v2056_v0 }
 0x12c   :  { %753 = vmatmul.mubr.bf16.gmra.mrb[56].mxu0 %v145_v31 }
 0x12d   :  { %762 = vmatprep.mubr.bf16.mxu0 %v2056_v0 }
 0x134   :  { %763 = vmatmul.mubr.bf16.gmra.mrb[60].mxu0 %v146_v34 }
 0x14f   :  { %v2227_v35 = vpop.f32.mrb[0].mxu1 }
 0x150   :  { %v2229_v36 = vpop.f32.mrb[1].mxu1 }
 0x151   :  { %v2231_v37 = vpop.f32.mrb[2].mxu1 }
 0x152   :  { %v2233_v38 = vpop.f32.mrb[3].mxu1 }
 0x157   :  { %v2235_v39 = vpop.f32.mrb[4].mxu1 }
 0x158   :  { %v2237_v40 = vpop.f32.mrb[5].mxu1 }
 0x159   :  { %v2239_v41 = vpop.f32.mrb[6].mxu1 }
 0x15a   :  { %v2241_v42 = vpop.f32.mrb[7].mxu1 }
 0x15f   :  { %v2243_v0 = vpop.f32.mrb[8].mxu1 }
 0x160   :  { %v2245_v43 = vpop.f32.mrb[9].mxu1 }
 0x161   :  { %v2247_v44 = vpop.f32.mrb[10].mxu1 }
 0x162   :  { %v2249_v45 = vpop.f32.mrb[11].mxu1 }
 0x167   :  { %v2251_v46 = vpop.f32.mrb[12].mxu1 }
 0x168   :  { %v2253_v47 = vpop.f32.mrb[13].mxu1 }
 0x169   :  { %v2255_v48 = vpop.f32.mrb[14].mxu1 }
 0x16a   :  { %v2257_v49 = vpop.f32.mrb[15].mxu1 }
 0x16f   :  { %v2259_v50 = vpop.f32.mrb[16].mxu1 }
 0x170   :  { %v2261_v51 = vpop.f32.mrb[17].mxu1 }
 0x171   :  { %v2263_v52 = vpop.f32.mrb[18].mxu1 }
 0x172   :  { %v2265_v53 = vpop.f32.mrb[19].mxu1 }
 0x177   :  { %v2267_v54 = vpop.f32.mrb[20].mxu1 }
 0x178   :  { %v2269_v55 = vpop.f32.mrb[21].mxu1 }
 0x179   :  { %v2271_v56 = vpop.f32.mrb[22].mxu1 }
 0x17a   :  { %v2273_v57 = vpop.f32.mrb[23].mxu1 }
 0x17f   :  { %v2275_v59 = vpop.f32.mrb[24].mxu1 }
 0x180   :  { %v2277_v60 = vpop.f32.mrb[25].mxu1 }
 0x181   :  { %v2279_v61 = vpop.f32.mrb[26].mxu1 }
 0x182   :  { %v2283_v63 = vpop.f32.mrb[27].mxu1 }
 0x187   :  { %v2290_v4 = vpop.f32.mrb[28].mxu1 }
 0x188   :  { %v2292_v5 = vpop.f32.mrb[29].mxu1 }
 0x189   :  { %v2294_v6 = vpop.f32.mrb[30].mxu1 }
 0x18a   :  { %v2300_v8 = vpop.f32.mrb[31].mxu1 }
 0x18f   :  { %v614_v10 = vpop.f32.mrb[0].mxu0 }
 0x190   :  { %v785_v11 = vadd.f32 %v2298_v7, %v614_v10  ;;  %v616_v12 = vpop.f32.mrb[1].mxu0 }
 0x191   :  { %v786_v13 = vadd.f32 %v2304_v9, %v616_v12  ;;  %v618_v14 = vpop.f32.mrb[2].mxu0 }
 0x192   :  { %vm849_vm0 = vcmp.gt.f32.partialorder %v785_v11, 0.0  ;;  %v913_v15 = vmul.f32 0.2, %v785_v11  ;;  %v787_v16 = vadd.f32 %v2298_v7, %v618_v14  ;;  %v620_v17 = vpop.f32.mrb[3].mxu0 }
 0x193   :  { %vm850_vm1 = vcmp.gt.f32.partialorder %v786_v13, 0.0  ;;  %v914_v18 = vmul.f32 0.2, %v786_v13  ;;  %v788_v19 = vadd.f32 %v2304_v9, %v620_v17 }
 0x194   :  { %v977_v20 = vsel %vm849_vm0, %v785_v11, %v913_v15  ;;  %vm851_vm2 = vcmp.gt.f32.partialorder %v787_v16, 0.0  ;;  %v915_v21 = vmul.f32 0.2, %v787_v16 }
 0x195   :  { %1041 = vst [vmem:[#allocation12] sm:$0xff] %v977_v20  ;;  %vm852_vm3 = vcmp.gt.f32.partialorder %v788_v19, 0.0  ;;  %v916_v22 = vmul.f32 0.2, %v788_v19  ;;  %v978_v23 = vsel %vm850_vm1, %v786_v13, %v914_v18 }
 0x196   :  { %v979_v24 = vsel %vm851_vm2, %v787_v16, %v915_v21  ;;  %1042 = vst [vmem:[#allocation12 + $0x8] sm:$0xff] %v978_v23 }
 0x197   :  { %1043 = vst [vmem:[#allocation12 + $0x10] sm:$0xff] %v979_v24  ;;  %v1105_v25 = vpack.c.bf16 %v979_v24, %v977_v20  ;;  %v624_v26 = vpop.f32.mrb[4].mxu0  ;;  %v980_v27 = vsel %vm852_vm3, %v788_v19, %v916_v22 }
 0x198   :  { %v789_v28 = vadd.f32 %v2298_v7, %v624_v26  ;;  %v626_v29 = vpop.f32.mrb[5].mxu0  ;;  %1044 = vst [vmem:[#allocation12 + $0x18] sm:$0xff] %v980_v27  ;;  %v1106_v30 = vpack.c.bf16 %v980_v27, %v978_v23 }
 0x199   :  { %v790_v31 = vadd.f32 %v2304_v9, %v626_v29  ;;  %v628_v32 = vpop.f32.mrb[6].mxu0 }
 0x19a   :  { %vm853_vm4 = vcmp.gt.f32.partialorder %v789_v28, 0.0  ;;  %v917_v33 = vmul.f32 0.2, %v789_v28  ;;  %v791_v34 = vadd.f32 %v2298_v7, %v628_v32  ;;  %v630_v58 = vpop.f32.mrb[7].mxu0  ;;  %1373 = vmatprep.mubr.bf16.mxu1 %v1106_v30 }
 0x19b   :  { %vm854_vm5 = vcmp.gt.f32.partialorder %v790_v31, 0.0  ;;  %v918_v2 = vmul.f32 0.2, %v790_v31  ;;  %v792_v10 = vadd.f32 %v2304_v9, %v630_v58  ;;  %1374 = vmatmul.mubr.bf16.vlgmr.msra.gmra.mrb[32].mxu1 %v1105_v25 }
 0x19c   :  { %vm855_vm6 = vcmp.gt.f32.partialorder %v791_v34, 0.0  ;;  %v919_v11 = vmul.f32 0.2, %v791_v34  ;;  %v981_v12 = vsel %vm853_vm4, %v789_v28, %v917_v33 }
 0x19d   :  { %vm856_vm7 = vcmp.gt.f32.partialorder %v792_v10, 0.0  ;;  %v920_v13 = vmul.f32 0.2, %v792_v10  ;;  %v982_v14 = vsel %vm854_vm5, %v790_v31, %v918_v2  ;;  %1045 = vst [vmem:[#allocation12 + $0x20] sm:$0xff] %v981_v12 }
 0x19e   :  { %1046 = vst [vmem:[#allocation12 + $0x28] sm:$0xff] %v982_v14  ;;  %v983_v15 = vsel %vm855_vm6, %v791_v34, %v919_v11 }
 0x19f   :  { %v634_v16 = vpop.f32.mrb[8].mxu0  ;;  %v984_v17 = vsel %vm856_vm7, %v792_v10, %v920_v13  ;;  %1047 = vst [vmem:[#allocation12 + $0x30] sm:$0xff] %v983_v15  ;;  %v1107_v18 = vpack.c.bf16 %v983_v15, %v981_v12 }
 0x1a0   :  { %v793_v19 = vadd.f32 %v2298_v7, %v634_v16  ;;  %v636_v20 = vpop.f32.mrb[9].mxu0  ;;  %1048 = vst [vmem:[#allocation12 + $0x38] sm:$0xff] %v984_v17  ;;  %v1108_v21 = vpack.c.bf16 %v984_v17, %v982_v14 }
 0x1a1   :  { %v794_v22 = vadd.f32 %v2304_v9, %v636_v20  ;;  %v638_v23 = vpop.f32.mrb[10].mxu0 }
 0x1a2   :  { %vm857_vm8 = vcmp.gt.f32.partialorder %v793_v19, 0.0  ;;  %v921_v24 = vmul.f32 0.2, %v793_v19  ;;  %v795_v25 = vadd.f32 %v2298_v7, %v638_v23  ;;  %v640_v26 = vpop.f32.mrb[11].mxu0  ;;  %1383 = vmatprep.mubr.bf16.mxu1 %v1108_v21 }
 0x1a3   :  { %vm858_vm9 = vcmp.gt.f32.partialorder %v794_v22, 0.0  ;;  %v922_v27 = vmul.f32 0.2, %v794_v22  ;;  %v796_v28 = vadd.f32 %v2304_v9, %v640_v26  ;;  %1384 = vmatmul.mubr.bf16.gmra.mrb[36].mxu1 %v1107_v18 }
 0x1a4   :  { %vm859_vm10 = vcmp.gt.f32.partialorder %v795_v25, 0.0  ;;  %v923_v29 = vmul.f32 0.2, %v795_v25  ;;  %v985_v30 = vsel %vm857_vm8, %v793_v19, %v921_v24 }
 0x1a5   :  { %vm860_vm11 = vcmp.gt.f32.partialorder %v796_v28, 0.0  ;;  %v924_v31 = vmul.f32 0.2, %v796_v28  ;;  %v986_v32 = vsel %vm858_vm9, %v794_v22, %v922_v27  ;;  %1049 = vst [vmem:[#allocation12 + $0x40] sm:$0xff] %v985_v30 }
 0x1a6   :  { %1050 = vst [vmem:[#allocation12 + $0x48] sm:$0xff] %v986_v32  ;;  %v987_v33 = vsel %vm859_vm10, %v795_v25, %v923_v29 }
 0x1a7   :  { %v644_v34 = vpop.f32.mrb[12].mxu0  ;;  %v988_v58 = vsel %vm860_vm11, %v796_v28, %v924_v31  ;;  %1051 = vst [vmem:[#allocation12 + $0x50] sm:$0xff] %v987_v33  ;;  %v1109_v2 = vpack.c.bf16 %v987_v33, %v985_v30 }
 0x1a8   :  { %v797_v10 = vadd.f32 %v2298_v7, %v644_v34  ;;  %v646_v11 = vpop.f32.mrb[13].mxu0  ;;  %1052 = vst [vmem:[#allocation12 + $0x58] sm:$0xff] %v988_v58  ;;  %v1110_v12 = vpack.c.bf16 %v988_v58, %v986_v32 }
 0x1a9   :  { %v798_v13 = vadd.f32 %v2304_v9, %v646_v11  ;;  %v648_v14 = vpop.f32.mrb[14].mxu0 }
 0x1aa   :  { %vm861_vm12 = vcmp.gt.f32.partialorder %v797_v10, 0.0  ;;  %v925_v15 = vmul.f32 0.2, %v797_v10  ;;  %v799_v16 = vadd.f32 %v2298_v7, %v648_v14  ;;  %v650_v17 = vpop.f32.mrb[15].mxu0  ;;  %1393 = vmatprep.mubr.bf16.mxu1 %v1110_v12 }
 0x1ab   :  { %vm862_vm13 = vcmp.gt.f32.partialorder %v798_v13, 0.0  ;;  %v926_v18 = vmul.f32 0.2, %v798_v13  ;;  %v800_v19 = vadd.f32 %v2304_v9, %v650_v17  ;;  %1394 = vmatmul.mubr.bf16.gmra.mrb[40].mxu1 %v1109_v2 }
 0x1ac   :  { %vm863_vm14 = vcmp.gt.f32.partialorder %v799_v16, 0.0  ;;  %v927_v20 = vmul.f32 0.2, %v799_v16  ;;  %v989_v21 = vsel %vm861_vm12, %v797_v10, %v925_v15 }
 0x1ad   :  { %vm864_vm15 = vcmp.gt.f32.partialorder %v800_v19, 0.0  ;;  %v928_v22 = vmul.f32 0.2, %v800_v19  ;;  %v990_v23 = vsel %vm862_vm13, %v798_v13, %v926_v18  ;;  %1053 = vst [vmem:[#allocation12 + $0x60] sm:$0xff] %v989_v21 }
 0x1ae   :  { %1054 = vst [vmem:[#allocation12 + $0x68] sm:$0xff] %v990_v23  ;;  %v991_v24 = vsel %vm863_vm14, %v799_v16, %v927_v20 }
 0x1af   :  { %v654_v25 = vpop.f32.mrb[16].mxu0  ;;  %v992_v26 = vsel %vm864_vm15, %v800_v19, %v928_v22  ;;  %1055 = vst [vmem:[#allocation12 + $0x70] sm:$0xff] %v991_v24  ;;  %v1111_v27 = vpack.c.bf16 %v991_v24, %v989_v21 }
 0x1b0   :  { %v801_v28 = vadd.f32 %v2298_v7, %v654_v25  ;;  %v656_v29 = vpop.f32.mrb[17].mxu0  ;;  %1056 = vst [vmem:[#allocation12 + $0x78] sm:$0xff] %v992_v26  ;;  %v1112_v30 = vpack.c.bf16 %v992_v26, %v990_v23 }
 0x1b1   :  { %v802_v31 = vadd.f32 %v2304_v9, %v656_v29  ;;  %v658_v32 = vpop.f32.mrb[18].mxu0 }
 0x1b2   :  { %vm865_vm0 = vcmp.gt.f32.partialorder %v801_v28, 0.0  ;;  %v929_v33 = vmul.f32 0.2, %v801_v28  ;;  %v803_v34 = vadd.f32 %v2298_v7, %v658_v32  ;;  %v660_v58 = vpop.f32.mrb[19].mxu0  ;;  %1403 = vmatprep.mubr.bf16.mxu1 %v1112_v30 }
 0x1b3   :  { %vm866_vm1 = vcmp.gt.f32.partialorder %v802_v31, 0.0  ;;  %v930_v2 = vmul.f32 0.2, %v802_v31  ;;  %v804_v10 = vadd.f32 %v2304_v9, %v660_v58  ;;  %1404 = vmatmul.mubr.bf16.gmra.mrb[44].mxu1 %v1111_v27 }
 0x1b4   :  { %vm867_vm2 = vcmp.gt.f32.partialorder %v803_v34, 0.0  ;;  %v931_v11 = vmul.f32 0.2, %v803_v34  ;;  %v993_v12 = vsel %vm865_vm0, %v801_v28, %v929_v33 }
 0x1b5   :  { %vm868_vm3 = vcmp.gt.f32.partialorder %v804_v10, 0.0  ;;  %v932_v13 = vmul.f32 0.2, %v804_v10  ;;  %v994_v14 = vsel %vm866_vm1, %v802_v31, %v930_v2  ;;  %1057 = vst [vmem:[#allocation12 + $0x80] sm:$0xff] %v993_v12 }
 0x1b6   :  { %1058 = vst [vmem:[#allocation12 + $0x88] sm:$0xff] %v994_v14  ;;  %v995_v15 = vsel %vm867_vm2, %v803_v34, %v931_v11 }
 0x1b7   :  { %v664_v16 = vpop.f32.mrb[20].mxu0  ;;  %v996_v17 = vsel %vm868_vm3, %v804_v10, %v932_v13  ;;  %1059 = vst [vmem:[#allocation12 + $0x90] sm:$0xff] %v995_v15  ;;  %v1113_v18 = vpack.c.bf16 %v995_v15, %v993_v12 }
 0x1b8   :  { %v805_v19 = vadd.f32 %v2298_v7, %v664_v16  ;;  %v666_v20 = vpop.f32.mrb[21].mxu0  ;;  %1060 = vst [vmem:[#allocation12 + $0x98] sm:$0xff] %v996_v17  ;;  %v1114_v21 = vpack.c.bf16 %v996_v17, %v994_v14 }
 0x1b9   :  { %v806_v22 = vadd.f32 %v2304_v9, %v666_v20  ;;  %v668_v23 = vpop.f32.mrb[22].mxu0 }
 0x1ba   :  { %vm869_vm4 = vcmp.gt.f32.partialorder %v805_v19, 0.0  ;;  %v933_v24 = vmul.f32 0.2, %v805_v19  ;;  %v807_v25 = vadd.f32 %v2298_v7, %v668_v23  ;;  %v670_v26 = vpop.f32.mrb[23].mxu0  ;;  %1413 = vmatprep.mubr.bf16.mxu1 %v1114_v21 }
 0x1bb   :  { %vm870_vm5 = vcmp.gt.f32.partialorder %v806_v22, 0.0  ;;  %v934_v27 = vmul.f32 0.2, %v806_v22  ;;  %v808_v28 = vadd.f32 %v2304_v9, %v670_v26  ;;  %1414 = vmatmul.mubr.bf16.gmra.mrb[48].mxu1 %v1113_v18 }
 0x1bc   :  { %vm871_vm6 = vcmp.gt.f32.partialorder %v807_v25, 0.0  ;;  %v935_v29 = vmul.f32 0.2, %v807_v25  ;;  %v997_v30 = vsel %vm869_vm4, %v805_v19, %v933_v24 }
 0x1bd   :  { %vm872_vm7 = vcmp.gt.f32.partialorder %v808_v28, 0.0  ;;  %v936_v31 = vmul.f32 0.2, %v808_v28  ;;  %v998_v32 = vsel %vm870_vm5, %v806_v22, %v934_v27  ;;  %1061 = vst [vmem:[#allocation12 + $0xa0] sm:$0xff] %v997_v30 }
 0x1be   :  { %1062 = vst [vmem:[#allocation12 + $0xa8] sm:$0xff] %v998_v32  ;;  %v999_v33 = vsel %vm871_vm6, %v807_v25, %v935_v29 }
 0x1bf   :  { %v674_v34 = vpop.f32.mrb[24].mxu0  ;;  %v1000_v58 = vsel %vm872_vm7, %v808_v28, %v936_v31  ;;  %1063 = vst [vmem:[#allocation12 + $0xb0] sm:$0xff] %v999_v33  ;;  %v1115_v2 = vpack.c.bf16 %v999_v33, %v997_v30 }
 0x1c0   :  { %v809_v10 = vadd.f32 %v2298_v7, %v674_v34  ;;  %v676_v11 = vpop.f32.mrb[25].mxu0  ;;  %1064 = vst [vmem:[#allocation12 + $0xb8] sm:$0xff] %v1000_v58  ;;  %v1116_v12 = vpack.c.bf16 %v1000_v58, %v998_v32 }
 0x1c1   :  { %v810_v13 = vadd.f32 %v2304_v9, %v676_v11  ;;  %v678_v14 = vpop.f32.mrb[26].mxu0 }
 0x1c2   :  { %vm873_vm8 = vcmp.gt.f32.partialorder %v809_v10, 0.0  ;;  %v937_v15 = vmul.f32 0.2, %v809_v10  ;;  %v811_v16 = vadd.f32 %v2298_v7, %v678_v14  ;;  %v680_v17 = vpop.f32.mrb[27].mxu0  ;;  %1423 = vmatprep.mubr.bf16.mxu1 %v1116_v12 }
 0x1c3   :  { %vm874_vm9 = vcmp.gt.f32.partialorder %v810_v13, 0.0  ;;  %v938_v18 = vmul.f32 0.2, %v810_v13  ;;  %v812_v19 = vadd.f32 %v2304_v9, %v680_v17  ;;  %1424 = vmatmul.mubr.bf16.gmra.mrb[52].mxu1 %v1115_v2 }
 0x1c4   :  { %vm875_vm10 = vcmp.gt.f32.partialorder %v811_v16, 0.0  ;;  %v939_v20 = vmul.f32 0.2, %v811_v16  ;;  %v1001_v21 = vsel %vm873_vm8, %v809_v10, %v937_v15 }
 0x1c5   :  { %vm876_vm11 = vcmp.gt.f32.partialorder %v812_v19, 0.0  ;;  %v940_v22 = vmul.f32 0.2, %v812_v19  ;;  %v1002_v23 = vsel %vm874_vm9, %v810_v13, %v938_v18  ;;  %1065 = vst [vmem:[#allocation12 + $0xc0] sm:$0xff] %v1001_v21 }
 0x1c6   :  { %1066 = vst [vmem:[#allocation12 + $0xc8] sm:$0xff] %v1002_v23  ;;  %v1003_v24 = vsel %vm875_vm10, %v811_v16, %v939_v20 }
 0x1c7   :  { %v684_v25 = vpop.f32.mrb[28].mxu0  ;;  %v1004_v26 = vsel %vm876_vm11, %v812_v19, %v940_v22  ;;  %1067 = vst [vmem:[#allocation12 + $0xd0] sm:$0xff] %v1003_v24  ;;  %v1117_v27 = vpack.c.bf16 %v1003_v24, %v1001_v21 }
 0x1c8   :  { %v813_v28 = vadd.f32 %v2298_v7, %v684_v25  ;;  %v686_v29 = vpop.f32.mrb[29].mxu0  ;;  %1068 = vst [vmem:[#allocation12 + $0xd8] sm:$0xff] %v1004_v26  ;;  %v1118_v30 = vpack.c.bf16 %v1004_v26, %v1002_v23 }
 0x1c9   :  { %v814_v31 = vadd.f32 %v2304_v9, %v686_v29  ;;  %v688_v32 = vpop.f32.mrb[30].mxu0 }
 0x1ca   :  { %vm877_vm12 = vcmp.gt.f32.partialorder %v813_v28, 0.0  ;;  %v941_v33 = vmul.f32 0.2, %v813_v28  ;;  %v815_v34 = vadd.f32 %v2298_v7, %v688_v32  ;;  %v690_v58 = vpop.f32.mrb[31].mxu0  ;;  %1433 = vmatprep.mubr.bf16.mxu1 %v1118_v30 }
 0x1cb   :  { %vm878_vm13 = vcmp.gt.f32.partialorder %v814_v31, 0.0  ;;  %v942_v2 = vmul.f32 0.2, %v814_v31  ;;  %v816_v10 = vadd.f32 %v2304_v9, %v690_v58  ;;  %1434 = vmatmul.mubr.bf16.gmra.mrb[56].mxu1 %v1117_v27 }
 0x1cc   :  { %vm879_vm14 = vcmp.gt.f32.partialorder %v815_v34, 0.0  ;;  %v943_v11 = vmul.f32 0.2, %v815_v34  ;;  %v1005_v12 = vsel %vm877_vm12, %v813_v28, %v941_v33 }
 0x1cd   :  { %vm880_vm15 = vcmp.gt.f32.partialorder %v816_v10, 0.0  ;;  %v944_v13 = vmul.f32 0.2, %v816_v10  ;;  %v1006_v14 = vsel %vm878_vm13, %v814_v31, %v942_v2  ;;  %1069 = vst [vmem:[#allocation12 + $0xe0] sm:$0xff] %v1005_v12 }
 0x1ce   :  { %1070 = vst [vmem:[#allocation12 + $0xe8] sm:$0xff] %v1006_v14  ;;  %v1007_v15 = vsel %vm879_vm14, %v815_v34, %v943_v11 }
 0x1cf   :  { %v694_v16 = vpop.f32.mrb[32].mxu0  ;;  %v1008_v17 = vsel %vm880_vm15, %v816_v10, %v944_v13  ;;  %1071 = vst [vmem:[#allocation12 + $0xf0] sm:$0xff] %v1007_v15  ;;  %v1119_v18 = vpack.c.bf16 %v1007_v15, %v1005_v12 }
 0x1d0   :  { %v695_v19 = vadd.f32 %v694_v16, %v2227_v35  ;;  %v696_v20 = vpop.f32.mrb[33].mxu0  ;;  %1072 = vst [vmem:[#allocation12 + $0xf8] sm:$0xff] %v1008_v17  ;;  %v1120_v21 = vpack.c.bf16 %v1008_v17, %v1006_v14 }
 0x1d1   :  { %v697_v22 = vadd.f32 %v696_v20, %v2229_v36  ;;  %v698_v23 = vpop.f32.mrb[34].mxu0 }
 0x1d2   :  { %v817_v24 = vadd.f32 %v2298_v7, %v695_v19  ;;  %v699_v25 = vadd.f32 %v698_v23, %v2231_v37  ;;  %v700_v26 = vpop.f32.mrb[35].mxu0  ;;  %1443 = vmatprep.mubr.bf16.mxu1 %v1120_v21 }
 0x1d3   :  { %v818_v27 = vadd.f32 %v2304_v9, %v697_v22  ;;  %v701_v28 = vadd.f32 %v700_v26, %v2233_v38  ;;  %1444 = vmatmul.mubr.bf16.gmra.mrb[60].mxu1 %v1119_v18 }
 0x1d4   :  { %vm881_vm0 = vcmp.gt.f32.partialorder %v817_v24, 0.0  ;;  %v945_v29 = vmul.f32 0.2, %v817_v24  ;;  %v819_v35 = vadd.f32 %v2298_v7, %v699_v25 }
 0x1d5   :  { %vm882_vm1 = vcmp.gt.f32.partialorder %v818_v27, 0.0  ;;  %v946_v30 = vmul.f32 0.2, %v818_v27  ;;  %v820_v36 = vadd.f32 %v2304_v9, %v701_v28 }
 0x1d6   :  { %vm883_vm2 = vcmp.gt.f32.partialorder %v819_v35, 0.0  ;;  %v947_v31 = vmul.f32 0.2, %v819_v35  ;;  %v1009_v32 = vsel %vm881_vm0, %v817_v24, %v945_v29 }
 0x1d7   :  { %vm884_vm3 = vcmp.gt.f32.partialorder %v820_v36, 0.0  ;;  %v948_v37 = vmul.f32 0.2, %v820_v36  ;;  %v704_v33 = vpop.f32.mrb[36].mxu0  ;;  %v1010_v34 = vsel %vm882_vm1, %v818_v27, %v946_v30  ;;  %1073 = vst [vmem:[#allocation12 + $0x100] sm:$0xff] %v1009_v32 }
 0x1d8   :  { %v705_v58 = vadd.f32 %v704_v33, %v2235_v39  ;;  %v706_v38 = vpop.f32.mrb[37].mxu0  ;;  %1074 = vst [vmem:[#allocation12 + $0x108] sm:$0xff] %v1010_v34  ;;  %v1011_v2 = vsel %vm883_vm2, %v819_v35, %v947_v31 }
 0x1d9   :  { %v707_v10 = vadd.f32 %v706_v38, %v2237_v40  ;;  %v708_v11 = vpop.f32.mrb[38].mxu0  ;;  %v1012_v12 = vsel %vm884_vm3, %v820_v36, %v948_v37  ;;  %1075 = vst [vmem:[#allocation12 + $0x110] sm:$0xff] %v1011_v2  ;;  %v1121_v13 = vpack.c.bf16 %v1011_v2, %v1009_v32 }
 0x1da   :  { %v821_v14 = vadd.f32 %v2298_v7, %v705_v58  ;;  %v709_v15 = vadd.f32 %v708_v11, %v2239_v41  ;;  %v710_v16 = vpop.f32.mrb[39].mxu0  ;;  %1076 = vst [vmem:[#allocation12 + $0x118] sm:$0xff] %v1012_v12  ;;  %v1122_v17 = vpack.c.bf16 %v1012_v12, %v1010_v34 }
 0x1db   :  { %v822_v18 = vadd.f32 %v2304_v9, %v707_v10  ;;  %v711_v39 = vadd.f32 %v710_v16, %v2241_v42 }
 0x1dc   :  { %vm885_vm4 = vcmp.gt.f32.partialorder %v821_v14, 0.0  ;;  %v949_v19 = vmul.f32 0.2, %v821_v14  ;;  %v823_v20 = vadd.f32 %v2298_v7, %v709_v15  ;;  %1453 = vmatprep.mubr.bf16.mxu1 %v1122_v17 }
 0x1dd   :  { %vm886_vm5 = vcmp.gt.f32.partialorder %v822_v18, 0.0  ;;  %v950_v40 = vmul.f32 0.2, %v822_v18  ;;  %v824_v21 = vadd.f32 %v2304_v9, %v711_v39  ;;  %1454 = vmatmul.mubr.bf16.gmra.mrb[64].mxu1 %v1121_v13 }
 0x1de   :  { %vm887_vm6 = vcmp.gt.f32.partialorder %v823_v20, 0.0  ;;  %v951_v22 = vmul.f32 0.2, %v823_v20  ;;  %v1013_v41 = vsel %vm885_vm4, %v821_v14, %v949_v19 }
 0x1df   :  { %vm888_vm7 = vcmp.gt.f32.partialorder %v824_v21, 0.0  ;;  %v952_v23 = vmul.f32 0.2, %v824_v21  ;;  %v714_v24 = vpop.f32.mrb[40].mxu0  ;;  %v1014_v25 = vsel %vm886_vm5, %v822_v18, %v950_v40  ;;  %1077 = vst [vmem:[#allocation12 + $0x120] sm:$0xff] %v1013_v41 }
 0x1e0   :  { %v715_v42 = vadd.f32 %v714_v24, %v2243_v0  ;;  %v716_v26 = vpop.f32.mrb[41].mxu0  ;;  %1078 = vst [vmem:[#allocation12 + $0x128] sm:$0xff] %v1014_v25  ;;  %v1015_v27 = vsel %vm887_vm6, %v823_v20, %v951_v22 }
 0x1e1   :  { %v717_v28 = vadd.f32 %v716_v26, %v2245_v43  ;;  %v718_v29 = vpop.f32.mrb[42].mxu0  ;;  %v1016_v35 = vsel %vm888_vm7, %v824_v21, %v952_v23  ;;  %1079 = vst [vmem:[#allocation12 + $0x130] sm:$0xff] %v1015_v27  ;;  %v1123_v30 = vpack.c.bf16 %v1015_v27, %v1013_v41 }
 0x1e2   :  { %v825_v36 = vadd.f32 %v2298_v7, %v715_v42  ;;  %v719_v31 = vadd.f32 %v718_v29, %v2247_v44  ;;  %v720_v32 = vpop.f32.mrb[43].mxu0  ;;  %1080 = vst [vmem:[#allocation12 + $0x138] sm:$0xff] %v1016_v35  ;;  %v1124_v37 = vpack.c.bf16 %v1016_v35, %v1014_v25 }
 0x1e3   :  { %v826_v33 = vadd.f32 %v2304_v9, %v717_v28  ;;  %v721_v0 = vadd.f32 %v720_v32, %v2249_v45 }
 0x1e4   :  { %vm889_vm8 = vcmp.gt.f32.partialorder %v825_v36, 0.0  ;;  %v953_v34 = vmul.f32 0.2, %v825_v36  ;;  %v827_v58 = vadd.f32 %v2298_v7, %v719_v31  ;;  %1463 = vmatprep.mubr.bf16.mxu1 %v1124_v37 }
 0x1e5   :  { %vm890_vm9 = vcmp.gt.f32.partialorder %v826_v33, 0.0  ;;  %v954_v43 = vmul.f32 0.2, %v826_v33  ;;  %v828_v38 = vadd.f32 %v2304_v9, %v721_v0  ;;  %1464 = vmatmul.mubr.bf16.gmra.mrb[68].mxu1 %v1123_v30 }
 0x1e6   :  { %vm891_vm10 = vcmp.gt.f32.partialorder %v827_v58, 0.0  ;;  %v955_v2 = vmul.f32 0.2, %v827_v58  ;;  %v1017_v44 = vsel %vm889_vm8, %v825_v36, %v953_v34 }
 0x1e7   :  { %vm892_vm11 = vcmp.gt.f32.partialorder %v828_v38, 0.0  ;;  %v956_v10 = vmul.f32 0.2, %v828_v38  ;;  %v724_v11 = vpop.f32.mrb[44].mxu0  ;;  %v1018_v12 = vsel %vm890_vm9, %v826_v33, %v954_v43  ;;  %1081 = vst [vmem:[#allocation12 + $0x140] sm:$0xff] %v1017_v44 }
 0x1e8   :  { %v725_v45 = vadd.f32 %v724_v11, %v2251_v46  ;;  %v726_v13 = vpop.f32.mrb[45].mxu0  ;;  %1082 = vst [vmem:[#allocation12 + $0x148] sm:$0xff] %v1018_v12  ;;  %v1019_v14 = vsel %vm891_vm10, %v827_v58, %v955_v2 }
 0x1e9   :  { %v727_v15 = vadd.f32 %v726_v13, %v2253_v47  ;;  %v728_v16 = vpop.f32.mrb[46].mxu0  ;;  %v1020_v17 = vsel %vm892_vm11, %v828_v38, %v956_v10  ;;  %1083 = vst [vmem:[#allocation12 + $0x150] sm:$0xff] %v1019_v14  ;;  %v1125_v18 = vpack.c.bf16 %v1019_v14, %v1017_v44 }
 0x1ea   :  { %v829_v39 = vadd.f32 %v2298_v7, %v725_v45  ;;  %v729_v19 = vadd.f32 %v728_v16, %v2255_v48  ;;  %v730_v20 = vpop.f32.mrb[47].mxu0  ;;  %1084 = vst [vmem:[#allocation12 + $0x158] sm:$0xff] %v1020_v17  ;;  %v1126_v40 = vpack.c.bf16 %v1020_v17, %v1018_v12 }
 0x1eb   :  { %v830_v21 = vadd.f32 %v2304_v9, %v727_v15  ;;  %v731_v46 = vadd.f32 %v730_v20, %v2257_v49 }
 0x1ec   :  { %vm893_vm12 = vcmp.gt.f32.partialorder %v829_v39, 0.0  ;;  %v957_v22 = vmul.f32 0.2, %v829_v39  ;;  %v831_v41 = vadd.f32 %v2298_v7, %v729_v19  ;;  %1473 = vmatprep.mubr.bf16.mxu1 %v1126_v40 }
 0x1ed   :  { %vm894_vm13 = vcmp.gt.f32.partialorder %v830_v21, 0.0  ;;  %v958_v47 = vmul.f32 0.2, %v830_v21  ;;  %v832_v23 = vadd.f32 %v2304_v9, %v731_v46  ;;  %1474 = vmatmul.mubr.bf16.gmra.mrb[72].mxu1 %v1125_v18 }
 0x1ee   :  { %vm895_vm14 = vcmp.gt.f32.partialorder %v831_v41, 0.0  ;;  %v959_v24 = vmul.f32 0.2, %v831_v41  ;;  %v1021_v48 = vsel %vm893_vm12, %v829_v39, %v957_v22 }
 0x1ef   :  { %vm896_vm15 = vcmp.gt.f32.partialorder %v832_v23, 0.0  ;;  %v960_v25 = vmul.f32 0.2, %v832_v23  ;;  %v734_v42 = vpop.f32.mrb[48].mxu0  ;;  %v1022_v26 = vsel %vm894_vm13, %v830_v21, %v958_v47  ;;  %1085 = vst [vmem:[#allocation12 + $0x160] sm:$0xff] %v1021_v48 }
 0x1f0   :  { %v735_v49 = vadd.f32 %v734_v42, %v2259_v50  ;;  %v736_v27 = vpop.f32.mrb[49].mxu0  ;;  %1086 = vst [vmem:[#allocation12 + $0x168] sm:$0xff] %v1022_v26  ;;  %v1023_v28 = vsel %vm895_vm14, %v831_v41, %v959_v24 }
 0x1f1   :  { %v737_v29 = vadd.f32 %v736_v27, %v2261_v51  ;;  %v738_v35 = vpop.f32.mrb[50].mxu0  ;;  %v1024_v30 = vsel %vm896_vm15, %v832_v23, %v960_v25  ;;  %1087 = vst [vmem:[#allocation12 + $0x170] sm:$0xff] %v1023_v28  ;;  %v1127_v36 = vpack.c.bf16 %v1023_v28, %v1021_v48 }
 0x1f2   :  { %v833_v31 = vadd.f32 %v2298_v7, %v735_v49  ;;  %v739_v32 = vadd.f32 %v738_v35, %v2263_v52  ;;  %v740_v37 = vpop.f32.mrb[51].mxu0  ;;  %1088 = vst [vmem:[#allocation12 + $0x178] sm:$0xff] %v1024_v30  ;;  %v1128_v33 = vpack.c.bf16 %v1024_v30, %v1022_v26 }
 0x1f3   :  { %v834_v0 = vadd.f32 %v2304_v9, %v737_v29  ;;  %v741_v50 = vadd.f32 %v740_v37, %v2265_v53 }
 0x1f4   :  { %vm897_vm0 = vcmp.gt.f32.partialorder %v833_v31, 0.0  ;;  %v961_v34 = vmul.f32 0.2, %v833_v31  ;;  %v835_v58 = vadd.f32 %v2298_v7, %v739_v32  ;;  %1483 = vmatprep.mubr.bf16.mxu1 %v1128_v33 }
 0x1f5   :  { %vm898_vm1 = vcmp.gt.f32.partialorder %v834_v0, 0.0  ;;  %v962_v51 = vmul.f32 0.2, %v834_v0  ;;  %v836_v43 = vadd.f32 %v2304_v9, %v741_v50  ;;  %1484 = vmatmul.mubr.bf16.gmra.mrb[76].mxu1 %v1127_v36 }
 0x1f6   :  { %vm899_vm2 = vcmp.gt.f32.partialorder %v835_v58, 0.0  ;;  %v963_v38 = vmul.f32 0.2, %v835_v58  ;;  %v1025_v52 = vsel %vm897_vm0, %v833_v31, %v961_v34 }
 0x1f7   :  { %vm900_vm3 = vcmp.gt.f32.partialorder %v836_v43, 0.0  ;;  %v964_v2 = vmul.f32 0.2, %v836_v43  ;;  %v744_v44 = vpop.f32.mrb[52].mxu0  ;;  %v1026_v10 = vsel %vm898_vm1, %v834_v0, %v962_v51  ;;  %1089 = vst [vmem:[#allocation12 + $0x180] sm:$0xff] %v1025_v52 }
 0x1f8   :  { %v745_v53 = vadd.f32 %v744_v44, %v2267_v54  ;;  %v746_v11 = vpop.f32.mrb[53].mxu0  ;;  %1090 = vst [vmem:[#allocation12 + $0x188] sm:$0xff] %v1026_v10  ;;  %v1027_v12 = vsel %vm899_vm2, %v835_v58, %v963_v38 }
 0x1f9   :  { %v747_v45 = vadd.f32 %v746_v11, %v2269_v55  ;;  %v748_v13 = vpop.f32.mrb[54].mxu0  ;;  %v1028_v14 = vsel %vm900_vm3, %v836_v43, %v964_v2  ;;  %1091 = vst [vmem:[#allocation12 + $0x190] sm:$0xff] %v1027_v12  ;;  %v1129_v15 = vpack.c.bf16 %v1027_v12, %v1025_v52 }
 0x1fa   :  { %v837_v16 = vadd.f32 %v2298_v7, %v745_v53  ;;  %v749_v17 = vadd.f32 %v748_v13, %v2271_v56  ;;  %v750_v18 = vpop.f32.mrb[55].mxu0  ;;  %1092 = vst [vmem:[#allocation12 + $0x198] sm:$0xff] %v1028_v14  ;;  %v1130_v39 = vpack.c.bf16 %v1028_v14, %v1026_v10 }
 0x1fb   :  { %v838_v19 = vadd.f32 %v2304_v9, %v747_v45  ;;  %v751_v54 = vadd.f32 %v750_v18, %v2273_v57 }
 0x1fc   :  { %vm901_vm4 = vcmp.gt.f32.partialorder %v837_v16, 0.0  ;;  %v965_v20 = vmul.f32 0.2, %v837_v16  ;;  %v839_v40 = vadd.f32 %v2298_v7, %v749_v17  ;;  %1493 = vmatprep.mubr.bf16.mxu1 %v1130_v39 }
 0x1fd   :  { %vm902_vm5 = vcmp.gt.f32.partialorder %v838_v19, 0.0  ;;  %v966_v55 = vmul.f32 0.2, %v838_v19  ;;  %v840_v21 = vadd.f32 %v2304_v9, %v751_v54  ;;  %1494 = vmatmul.mubr.bf16.gmra.mrb[80].mxu1 %v1129_v15 }
 0x1fe   :  { %vm903_vm6 = vcmp.gt.f32.partialorder %v839_v40, 0.0  ;;  %v967_v46 = vmul.f32 0.2, %v839_v40  ;;  %v1029_v56 = vsel %vm901_vm4, %v837_v16, %v965_v20 }
 0x1ff   :  { %vm904_vm7 = vcmp.gt.f32.partialorder %v840_v21, 0.0  ;;  %v968_v22 = vmul.f32 0.2, %v840_v21  ;;  %v754_v41 = vpop.f32.mrb[56].mxu0  ;;  %v1030_v47 = vsel %vm902_vm5, %v838_v19, %v966_v55  ;;  %1093 = vst [vmem:[#allocation12 + $0x1a0] sm:$0xff] %v1029_v56 }
 0x200   :  { %v755_v57 = vadd.f32 %v754_v41, %v2275_v59  ;;  %v756_v23 = vpop.f32.mrb[57].mxu0  ;;  %1094 = vst [vmem:[#allocation12 + $0x1a8] sm:$0xff] %v1030_v47  ;;  %v1031_v24 = vsel %vm903_vm6, %v839_v40, %v967_v46 }
 0x201   :  { %v757_v48 = vadd.f32 %v756_v23, %v2277_v60  ;;  %v758_v25 = vpop.f32.mrb[58].mxu0  ;;  %v1032_v42 = vsel %vm904_vm7, %v840_v21, %v968_v22  ;;  %1095 = vst [vmem:[#allocation12 + $0x1b0] sm:$0xff] %v1031_v24  ;;  %v1131_v26 = vpack.c.bf16 %v1031_v24, %v1029_v56 }
 0x202   :  { %v841_v49 = vadd.f32 %v2298_v7, %v755_v57  ;;  %v759_v27 = vadd.f32 %v758_v25, %v2279_v61  ;;  %v760_v28 = vpop.f32.mrb[59].mxu0  ;;  %1096 = vst [vmem:[#allocation12 + $0x1b8] sm:$0xff] %v1032_v42  ;;  %v1132_v29 = vpack.c.bf16 %v1032_v42, %v1030_v47 }
 0x203   :  { %v842_v35 = vadd.f32 %v2304_v9, %v757_v48  ;;  %v761_v59 = vadd.f32 %v760_v28, %v2283_v63 }
 0x204   :  { %vm905_vm8 = vcmp.gt.f32.partialorder %v841_v49, 0.0  ;;  %v969_v30 = vmul.f32 0.2, %v841_v49  ;;  %v843_v36 = vadd.f32 %v2298_v7, %v759_v27  ;;  %1503 = vmatprep.mubr.bf16.mxu1 %v1132_v29 }
 0x205   :  { %vm906_vm9 = vcmp.gt.f32.partialorder %v842_v35, 0.0  ;;  %v970_v60 = vmul.f32 0.2, %v842_v35  ;;  %v844_v31 = vadd.f32 %v2304_v9, %v761_v59  ;;  %1504 = vmatmul.mubr.bf16.gmra.mrb[84].mxu1 %v1131_v26 }
 0x206   :  { %vm907_vm10 = vcmp.gt.f32.partialorder %v843_v36, 0.0  ;;  %v971_v32 = vmul.f32 0.2, %v843_v36  ;;  %v1033_v61 = vsel %vm905_vm8, %v841_v49, %v969_v30 }
 0x207   :  { %vm908_vm11 = vcmp.gt.f32.partialorder %v844_v31, 0.0  ;;  %v972_v37 = vmul.f32 0.2, %v844_v31  ;;  %v764_v33 = vpop.f32.mrb[60].mxu0  ;;  %v1034_v0 = vsel %vm906_vm9, %v842_v35, %v970_v60  ;;  %1097 = vst [vmem:[#allocation12 + $0x1c0] sm:$0xff] %v1033_v61 }
 0x208   :  { %v765_v63 = vadd.f32 %v764_v33, %v2290_v4  ;;  %v766_v50 = vpop.f32.mrb[61].mxu0  ;;  %1098 = vst [vmem:[#allocation12 + $0x1c8] sm:$0xff] %v1034_v0  ;;  %v1035_v34 = vsel %vm907_vm10, %v843_v36, %v971_v32 }
 0x209   :  { %v767_v58 = vadd.f32 %v766_v50, %v2292_v5  ;;  %v768_v51 = vpop.f32.mrb[62].mxu0  ;;  %v1036_v43 = vsel %vm908_vm11, %v844_v31, %v972_v37  ;;  %1099 = vst [vmem:[#allocation12 + $0x1d0] sm:$0xff] %v1035_v34  ;;  %v1133_v38 = vpack.c.bf16 %v1035_v34, %v1033_v61 }
 0x20a   :  { %v845_v52 = vadd.f32 %v2298_v7, %v765_v63  ;;  %v769_v2 = vadd.f32 %v768_v51, %v2294_v6  ;;  %v770_v44 = vpop.f32.mrb[63].mxu0  ;;  %1100 = vst [vmem:[#allocation12 + $0x1d8] sm:$0xff] %v1036_v43  ;;  %v1134_v10 = vpack.c.bf16 %v1036_v43, %v1034_v0 }
 0x20b   :  { %v846_v53 = vadd.f32 %v2304_v9, %v767_v58  ;;  %v771_v4 = vadd.f32 %v770_v44, %v2300_v8 }
 0x20c   :  { %vm909_vm12 = vcmp.gt.f32.partialorder %v845_v52, 0.0  ;;  %v973_v11 = vmul.f32 0.2, %v845_v52  ;;  %v847_v12 = vadd.f32 %v2298_v7, %v769_v2  ;;  %1513 = vmatprep.mubr.bf16.mxu1 %v1134_v10 }
 0x20d   :  { %vm910_vm13 = vcmp.gt.f32.partialorder %v846_v53, 0.0  ;;  %v974_v5 = vmul.f32 0.2, %v846_v53  ;;  %v848_v45 = vadd.f32 %v2304_v9, %v771_v4  ;;  %1514 = vmatmul.mubr.bf16.gmra.mrb[88].mxu1 %v1133_v38  ;;  %v1169_v9 = vld [vmem:[%s2513_s6] sm:$0x3] }
 0x20e   :  { %vm911_vm14 = vcmp.gt.f32.partialorder %v847_v12, 0.0  ;;  %v975_v13 = vmul.f32 0.2, %v847_v12  ;;  %v1037_v6 = vsel %vm909_vm12, %v845_v52, %v973_v11  ;;  %v2407_v18 = vrot.slane %v1169_v9, %v777_v1 }
 0x20f   :  { %vm912_vm15 = vcmp.gt.f32.partialorder %v848_v45, 0.0  ;;  %v976_v14 = vmul.f32 0.2, %v848_v45  ;;  %v1038_v15 = vsel %vm910_vm13, %v846_v53, %v974_v5  ;;  %1101 = vst [vmem:[#allocation12 + $0x1e0] sm:$0xff] %v1037_v6  ;;  %v2411_v39 = vrot.slane %v1169_v9, %v781_v3 }
 0x210   :  { %1102 = vst [vmem:[#allocation12 + $0x1e8] sm:$0xff] %v1038_v15  ;;  %v1039_v16 = vsel %vm911_vm14, %v847_v12, %v975_v13 }
 0x211   :  { %v1040_v8 = vsel %vm912_vm15, %v848_v45, %v976_v14  ;;  %1103 = vst [vmem:[#allocation12 + $0x1f0] sm:$0xff] %v1039_v16  ;;  %v1135_v17 = vpack.c.bf16 %v1039_v16, %v1037_v6 }
 0x212   :  { %1104 = vst [vmem:[#allocation12 + $0x1f8] sm:$0xff] %v1040_v8  ;;  %v1136_v7 = vpack.c.bf16 %v1040_v8, %v1038_v15 }
 0x214   :  { %1523 = vmatprep.mubr.bf16.mxu1 %v1136_v7 }
 0x215   :  { %1524 = vmatmul.mubr.bf16.gmra.mrb[92].mxu1 %v1135_v17 }
 0x26e   :  { %v1375_v19 = vpop.f32.mrb[32].mxu1 }
 0x26f   :  { %v1376_v54 = vadd.f32 %v1375_v19, %v2407_v18  ;;  %v1377_v20 = vpop.f32.mrb[33].mxu1 }
 0x270   :  { %v1378_v40 = vadd.f32 %v1377_v20, %v2411_v39  ;;  %v1379_v55 = vpop.f32.mrb[34].mxu1 }
 0x271   :  { %2006 = shalt.err (!%p2003_p2)
}
 0x272   :  { %s2007_s25 = scalar_lea.hbm %s2515_s8, 8192 }
 0x273   :  { %p2008_p3 = scmp.ne.s32.totalorder %s2515_s8, %s2007_s25  ;;  %p2011_p4 = scmp.lt.u32.totalorder %s2007_s25, %s2515_s8 }
 0x275   :  { %p2013_p5 = pnand %p2011_p4, %p2008_p3 }
 0x277   :  { %2016 = shalt.err (!%p2013_p5)
}
 0x278   :  { %s2058_s28 = smov 256   ;;  %s2059_s0 = smov 16   ;;  %1534 = vst [vmem:[#allocation11] sm:$0xff] %v1376_v54  ;;  %v1380_v62 = vadd.f32 %v1379_v55, %v2407_v18  ;;  %v1381_v1 = vpop.f32.mrb[35].mxu1  ;;  %1535 = vst [vmem:[#allocation11 + $0x8] sm:$0xff] %v1378_v40 }
 0x279   :  { %1621 = dma.vmem_to_hbm [thread:$0]  %s1616_s22, 8192, %s2515_s8, [#allocation13], %s2058_s28, %s2058_s28, %s2059_s0   ;;  %v1382_v3 = vadd.f32 %v1381_v1, %v2411_v39  ;;  %v1385_v21 = vpop.f32.mrb[36].mxu1 }
 0x27a   :  { %1536 = vst [vmem:[#allocation11 + $0x10] sm:$0xff] %v1380_v62  ;;  %v1386_v46 = vadd.f32 %v1385_v21, %v2407_v18  ;;  %v1387_v56 = vpop.f32.mrb[37].mxu1  ;;  %s2060_s8 = smov [#allocation11]  }
 0x27b   :  { %1537 = vst [vmem:[#allocation11 + $0x18] sm:$0xff] %v1382_v3  ;;  %v1388_v22 = vadd.f32 %v1387_v56, %v2411_v39  ;;  %v1389_v41 = vpop.f32.mrb[38].mxu1  ;;  %s1603_s11 = sshll.u32 %s2060_s8, 4  ;;  %s1604_s11 = int_to_ptr.vmem [resolvable:$true] %s1603_s11 }
 0x27c   :  { %1538 = vst [vmem:[#allocation11 + $0x20] sm:$0xff] %v1386_v46  ;;  %v1390_v47 = vadd.f32 %v1389_v41, %v2407_v18  ;;  %v1391_v57 = vpop.f32.mrb[39].mxu1  ;;  %s2017_s13 = scalar_lea.vmem %s1604_s11, 8192  ;;  %p2022_p7 = scmp.lt.s32.totalorder %s1604_s11, %s1604_s11 }
 0x27d   :  { %1539 = vst [vmem:[#allocation11 + $0x28] sm:$0xff] %v1388_v22  ;;  %v1392_v23 = vadd.f32 %v1391_v57, %v2411_v39  ;;  %p2018_p6 = scmp.ne.s32.totalorder %s1604_s11, %s2017_s13  ;;  %p2023_p8 = scmp.lt.s32.totalorder %s2017_s13, %s2017_s13 }
 0x27e   :  { %1540 = vst [vmem:[#allocation11 + $0x30] sm:$0xff] %v1390_v47  ;;  %v1395_v24 = vpop.f32.mrb[40].mxu1 }
 0x27f   :  { %1541 = vst [vmem:[#allocation11 + $0x38] sm:$0xff] %v1392_v23  ;;  %v1396_v48 = vadd.f32 %v1395_v24, %v2407_v18  ;;  %v1397_v25 = vpop.f32.mrb[41].mxu1  ;;  %p2024_p9 = por %p2023_p8, %p2022_p7 }
 0x280   :  { %v1398_v42 = vadd.f32 %v1397_v25, %v2411_v39  ;;  %v1399_v26 = vpop.f32.mrb[42].mxu1 }
 0x281   :  { %1542 = vst [vmem:[#allocation11 + $0x40] sm:$0xff] %v1396_v48  ;;  %v1400_v49 = vadd.f32 %v1399_v26, %v2407_v18  ;;  %v1401_v27 = vpop.f32.mrb[43].mxu1  ;;  %p2025_p10 = pnand %p2024_p9, %p2018_p6 }
 0x282   :  { %1543 = vst [vmem:[#allocation11 + $0x48] sm:$0xff] %v1398_v42  ;;  %v1402_v28 = vadd.f32 %v1401_v27, %v2411_v39 }
 0x283   :  { %1544 = vst [vmem:[#allocation11 + $0x50] sm:$0xff] %v1400_v49 }
 0x284   :  { %1545 = vst [vmem:[#allocation11 + $0x58] sm:$0xff] %v1402_v28 }
 0x286   :  { %v1405_v29 = vpop.f32.mrb[44].mxu1 }
 0x287   :  { %v1406_v35 = vadd.f32 %v1405_v29, %v2407_v18  ;;  %v1407_v59 = vpop.f32.mrb[45].mxu1 }
 0x288   :  { %v1408_v30 = vadd.f32 %v1407_v59, %v2411_v39  ;;  %v1409_v36 = vpop.f32.mrb[46].mxu1 }
 0x289   :  { %1546 = vst [vmem:[#allocation11 + $0x60] sm:$0xff] %v1406_v35  ;;  %v1410_v60 = vadd.f32 %v1409_v36, %v2407_v18  ;;  %v1411_v31 = vpop.f32.mrb[47].mxu1 }
 0x28a   :  { %1547 = vst [vmem:[#allocation11 + $0x68] sm:$0xff] %v1408_v30  ;;  %v1412_v32 = vadd.f32 %v1411_v31, %v2411_v39 }
 0x28b   :  { %1548 = vst [vmem:[#allocation11 + $0x70] sm:$0xff] %v1410_v60 }
 0x28c   :  { %1549 = vst [vmem:[#allocation11 + $0x78] sm:$0xff] %v1412_v32 }
 0x28e   :  { %v1415_v61 = vpop.f32.mrb[48].mxu1 }
 0x28f   :  { %v1416_v37 = vadd.f32 %v1415_v61, %v2407_v18  ;;  %v1417_v33 = vpop.f32.mrb[49].mxu1 }
 0x290   :  { %v1418_v0 = vadd.f32 %v1417_v33, %v2411_v39  ;;  %v1419_v63 = vpop.f32.mrb[50].mxu1 }
 0x291   :  { %1550 = vst [vmem:[#allocation11 + $0x80] sm:$0xff] %v1416_v37  ;;  %v1420_v50 = vadd.f32 %v1419_v63, %v2407_v18  ;;  %v1421_v34 = vpop.f32.mrb[51].mxu1 }
 0x292   :  { %1551 = vst [vmem:[#allocation11 + $0x88] sm:$0xff] %v1418_v0  ;;  %v1422_v58 = vadd.f32 %v1421_v34, %v2411_v39 }
 0x293   :  { %1552 = vst [vmem:[#allocation11 + $0x90] sm:$0xff] %v1420_v50 }
 0x294   :  { %1553 = vst [vmem:[#allocation11 + $0x98] sm:$0xff] %v1422_v58 }
 0x296   :  { %v1425_v51 = vpop.f32.mrb[52].mxu1 }
 0x297   :  { %v1426_v43 = vadd.f32 %v1425_v51, %v2407_v18  ;;  %v1427_v38 = vpop.f32.mrb[53].mxu1 }
 0x298   :  { %v1428_v52 = vadd.f32 %v1427_v38, %v2411_v39  ;;  %v1429_v2 = vpop.f32.mrb[54].mxu1 }
 0x299   :  { %1554 = vst [vmem:[#allocation11 + $0xa0] sm:$0xff] %v1426_v43  ;;  %v1430_v44 = vadd.f32 %v1429_v2, %v2407_v18  ;;  %v1431_v10 = vpop.f32.mrb[55].mxu1 }
 0x29a   :  { %1555 = vst [vmem:[#allocation11 + $0xa8] sm:$0xff] %v1428_v52  ;;  %v1432_v53 = vadd.f32 %v1431_v10, %v2411_v39 }
 0x29b   :  { %1556 = vst [vmem:[#allocation11 + $0xb0] sm:$0xff] %v1430_v44 }
 0x29c   :  { %1557 = vst [vmem:[#allocation11 + $0xb8] sm:$0xff] %v1432_v53 }
 0x29e   :  { %v1435_v4 = vpop.f32.mrb[56].mxu1 }
 0x29f   :  { %v1436_v11 = vadd.f32 %v1435_v4, %v2407_v18  ;;  %v1437_v12 = vpop.f32.mrb[57].mxu1 }
 0x2a0   :  { %v1438_v5 = vadd.f32 %v1437_v12, %v2411_v39  ;;  %v1439_v45 = vpop.f32.mrb[58].mxu1 }
 0x2a1   :  { %1558 = vst [vmem:[#allocation11 + $0xc0] sm:$0xff] %v1436_v11  ;;  %v1440_v13 = vadd.f32 %v1439_v45, %v2407_v18  ;;  %v1441_v6 = vpop.f32.mrb[59].mxu1 }
 0x2a2   :  { %1559 = vst [vmem:[#allocation11 + $0xc8] sm:$0xff] %v1438_v5  ;;  %v1442_v14 = vadd.f32 %v1441_v6, %v2411_v39 }
 0x2a3   :  { %1560 = vst [vmem:[#allocation11 + $0xd0] sm:$0xff] %v1440_v13 }
 0x2a4   :  { %1561 = vst [vmem:[#allocation11 + $0xd8] sm:$0xff] %v1442_v14 }
 0x2a6   :  { %v1445_v15 = vpop.f32.mrb[60].mxu1 }
 0x2a7   :  { %v1446_v16 = vadd.f32 %v1445_v15, %v2407_v18  ;;  %v1447_v8 = vpop.f32.mrb[61].mxu1 }
 0x2a8   :  { %v1448_v17 = vadd.f32 %v1447_v8, %v2411_v39  ;;  %v1449_v7 = vpop.f32.mrb[62].mxu1 }
 0x2a9   :  { %1562 = vst [vmem:[#allocation11 + $0xe0] sm:$0xff] %v1446_v16  ;;  %v1450_v9 = vadd.f32 %v1449_v7, %v2407_v18  ;;  %v1451_v19 = vpop.f32.mrb[63].mxu1 }
 0x2aa   :  { %1563 = vst [vmem:[#allocation11 + $0xe8] sm:$0xff] %v1448_v17  ;;  %v1452_v54 = vadd.f32 %v1451_v19, %v2411_v39 }
 0x2ab   :  { %1564 = vst [vmem:[#allocation11 + $0xf0] sm:$0xff] %v1450_v9 }
 0x2ac   :  { %1565 = vst [vmem:[#allocation11 + $0xf8] sm:$0xff] %v1452_v54 }
 0x2b0   :  { %v1455_v20 = vpop.f32.mrb[64].mxu1 }
 0x2b1   :  { %v1456_v40 = vadd.f32 %v1455_v20, %v2407_v18  ;;  %v1457_v55 = vpop.f32.mrb[65].mxu1 }
 0x2b2   :  { %v1458_v62 = vadd.f32 %v1457_v55, %v2411_v39  ;;  %v1459_v1 = vpop.f32.mrb[66].mxu1 }
 0x2b3   :  { %1566 = vst [vmem:[#allocation11 + $0x100] sm:$0xff] %v1456_v40  ;;  %v1460_v3 = vadd.f32 %v1459_v1, %v2407_v18  ;;  %v1461_v21 = vpop.f32.mrb[67].mxu1 }
 0x2b4   :  { %1567 = vst [vmem:[#allocation11 + $0x108] sm:$0xff] %v1458_v62  ;;  %v1462_v46 = vadd.f32 %v1461_v21, %v2411_v39 }
 0x2b5   :  { %1568 = vst [vmem:[#allocation11 + $0x110] sm:$0xff] %v1460_v3 }
 0x2b6   :  { %1569 = vst [vmem:[#allocation11 + $0x118] sm:$0xff] %v1462_v46 }
 0x2b8   :  { %v1465_v56 = vpop.f32.mrb[68].mxu1 }
 0x2b9   :  { %v1466_v22 = vadd.f32 %v1465_v56, %v2407_v18  ;;  %v1467_v41 = vpop.f32.mrb[69].mxu1 }
 0x2ba   :  { %v1468_v47 = vadd.f32 %v1467_v41, %v2411_v39  ;;  %v1469_v57 = vpop.f32.mrb[70].mxu1 }
 0x2bb   :  { %1570 = vst [vmem:[#allocation11 + $0x120] sm:$0xff] %v1466_v22  ;;  %v1470_v23 = vadd.f32 %v1469_v57, %v2407_v18  ;;  %v1471_v24 = vpop.f32.mrb[71].mxu1 }
 0x2bc   :  { %1571 = vst [vmem:[#allocation11 + $0x128] sm:$0xff] %v1468_v47  ;;  %v1472_v48 = vadd.f32 %v1471_v24, %v2411_v39 }
 0x2bd   :  { %1572 = vst [vmem:[#allocation11 + $0x130] sm:$0xff] %v1470_v23 }
 0x2be   :  { %1573 = vst [vmem:[#allocation11 + $0x138] sm:$0xff] %v1472_v48 }
 0x2c0   :  { %v1475_v25 = vpop.f32.mrb[72].mxu1 }
 0x2c1   :  { %v1476_v42 = vadd.f32 %v1475_v25, %v2407_v18  ;;  %v1477_v26 = vpop.f32.mrb[73].mxu1 }
 0x2c2   :  { %v1478_v49 = vadd.f32 %v1477_v26, %v2411_v39  ;;  %v1479_v27 = vpop.f32.mrb[74].mxu1 }
 0x2c3   :  { %1574 = vst [vmem:[#allocation11 + $0x140] sm:$0xff] %v1476_v42  ;;  %v1480_v28 = vadd.f32 %v1479_v27, %v2407_v18  ;;  %v1481_v29 = vpop.f32.mrb[75].mxu1 }
 0x2c4   :  { %1575 = vst [vmem:[#allocation11 + $0x148] sm:$0xff] %v1478_v49  ;;  %v1482_v35 = vadd.f32 %v1481_v29, %v2411_v39 }
 0x2c5   :  { %1576 = vst [vmem:[#allocation11 + $0x150] sm:$0xff] %v1480_v28 }
 0x2c6   :  { %1577 = vst [vmem:[#allocation11 + $0x158] sm:$0xff] %v1482_v35 }
 0x2c8   :  { %v1485_v59 = vpop.f32.mrb[76].mxu1 }
 0x2c9   :  { %v1486_v30 = vadd.f32 %v1485_v59, %v2407_v18  ;;  %v1487_v36 = vpop.f32.mrb[77].mxu1 }
 0x2ca   :  { %v1488_v60 = vadd.f32 %v1487_v36, %v2411_v39  ;;  %v1489_v31 = vpop.f32.mrb[78].mxu1 }
 0x2cb   :  { %1578 = vst [vmem:[#allocation11 + $0x160] sm:$0xff] %v1486_v30  ;;  %v1490_v32 = vadd.f32 %v1489_v31, %v2407_v18  ;;  %v1491_v61 = vpop.f32.mrb[79].mxu1 }
 0x2cc   :  { %1579 = vst [vmem:[#allocation11 + $0x168] sm:$0xff] %v1488_v60  ;;  %v1492_v37 = vadd.f32 %v1491_v61, %v2411_v39 }
 0x2cd   :  { %1580 = vst [vmem:[#allocation11 + $0x170] sm:$0xff] %v1490_v32 }
 0x2ce   :  { %1581 = vst [vmem:[#allocation11 + $0x178] sm:$0xff] %v1492_v37 }
 0x2d0   :  { %v1495_v33 = vpop.f32.mrb[80].mxu1 }
 0x2d1   :  { %v1496_v0 = vadd.f32 %v1495_v33, %v2407_v18  ;;  %v1497_v63 = vpop.f32.mrb[81].mxu1 }
 0x2d2   :  { %v1498_v50 = vadd.f32 %v1497_v63, %v2411_v39  ;;  %v1499_v34 = vpop.f32.mrb[82].mxu1 }
 0x2d3   :  { %1582 = vst [vmem:[#allocation11 + $0x180] sm:$0xff] %v1496_v0  ;;  %v1500_v58 = vadd.f32 %v1499_v34, %v2407_v18  ;;  %v1501_v51 = vpop.f32.mrb[83].mxu1 }
 0x2d4   :  { %1583 = vst [vmem:[#allocation11 + $0x188] sm:$0xff] %v1498_v50  ;;  %v1502_v43 = vadd.f32 %v1501_v51, %v2411_v39 }
 0x2d5   :  { %1584 = vst [vmem:[#allocation11 + $0x190] sm:$0xff] %v1500_v58 }
 0x2d6   :  { %1585 = vst [vmem:[#allocation11 + $0x198] sm:$0xff] %v1502_v43 }
 0x2d8   :  { %v1505_v38 = vpop.f32.mrb[84].mxu1 }
 0x2d9   :  { %v1506_v52 = vadd.f32 %v1505_v38, %v2407_v18  ;;  %v1507_v2 = vpop.f32.mrb[85].mxu1 }
 0x2da   :  { %v1508_v44 = vadd.f32 %v1507_v2, %v2411_v39  ;;  %v1509_v10 = vpop.f32.mrb[86].mxu1 }
 0x2db   :  { %1586 = vst [vmem:[#allocation11 + $0x1a0] sm:$0xff] %v1506_v52  ;;  %v1510_v53 = vadd.f32 %v1509_v10, %v2407_v18  ;;  %v1511_v4 = vpop.f32.mrb[87].mxu1 }
 0x2dc   :  { %1587 = vst [vmem:[#allocation11 + $0x1a8] sm:$0xff] %v1508_v44  ;;  %v1512_v11 = vadd.f32 %v1511_v4, %v2411_v39 }
 0x2dd   :  { %1588 = vst [vmem:[#allocation11 + $0x1b0] sm:$0xff] %v1510_v53 }
 0x2de   :  { %1589 = vst [vmem:[#allocation11 + $0x1b8] sm:$0xff] %v1512_v11 }
 0x2e0   :  { %v1515_v12 = vpop.f32.mrb[88].mxu1 }
 0x2e1   :  { %v1516_v5 = vadd.f32 %v1515_v12, %v2407_v18  ;;  %v1517_v45 = vpop.f32.mrb[89].mxu1 }
 0x2e2   :  { %v1518_v13 = vadd.f32 %v1517_v45, %v2411_v39  ;;  %v1519_v6 = vpop.f32.mrb[90].mxu1 }
 0x2e3   :  { %1590 = vst [vmem:[#allocation11 + $0x1c0] sm:$0xff] %v1516_v5  ;;  %v1520_v14 = vadd.f32 %v1519_v6, %v2407_v18  ;;  %v1521_v15 = vpop.f32.mrb[91].mxu1 }
 0x2e4   :  { %1591 = vst [vmem:[#allocation11 + $0x1c8] sm:$0xff] %v1518_v13  ;;  %v1522_v16 = vadd.f32 %v1521_v15, %v2411_v39 }
 0x2e5   :  { %1592 = vst [vmem:[#allocation11 + $0x1d0] sm:$0xff] %v1520_v14 }
 0x2e6   :  { %1593 = vst [vmem:[#allocation11 + $0x1d8] sm:$0xff] %v1522_v16 }
 0x2e8   :  { %v1525_v8 = vpop.f32.mrb[92].mxu1 }
 0x2e9   :  { %v1526_v17 = vadd.f32 %v1525_v8, %v2407_v18  ;;  %v1527_v7 = vpop.f32.mrb[93].mxu1 }
 0x2ea   :  { %v1528_v9 = vadd.f32 %v1527_v7, %v2411_v39  ;;  %v1529_v19 = vpop.f32.mrb[94].mxu1 }
 0x2eb   :  { %1594 = vst [vmem:[#allocation11 + $0x1e0] sm:$0xff] %v1526_v17  ;;  %v1530_v54 = vadd.f32 %v1529_v19, %v2407_v18  ;;  %v1531_v20 = vpop.f32.mrb[95].mxu1 }
 0x2ec   :  { %1595 = vst [vmem:[#allocation11 + $0x1e8] sm:$0xff] %v1528_v9  ;;  %v1532_v40 = vadd.f32 %v1531_v20, %v2411_v39 }
 0x2ed   :  { %1596 = vst [vmem:[#allocation11 + $0x1f0] sm:$0xff] %v1530_v54 }
 0x2ee   :  { %1597 = vst [vmem:[#allocation11 + $0x1f8] sm:$0xff] %v1532_v40 }
 0x2ef   :  { %2028 = shalt.err (!%p2025_p10)
}
 0x2f0   :  { %s2029_s16 = scalar_lea.hbm %s2514_s7, 8192 }
 0x2f1   :  { %p2030_p11 = scmp.ne.s32.totalorder %s2514_s7, %s2029_s16  ;;  %p2033_p12 = scmp.lt.u32.totalorder %s2029_s16, %s2514_s7 }
 0x2f3   :  { %p2035_p13 = pnand %p2033_p12, %p2030_p11 }
 0x2f5   :  { %2038 = shalt.err (!%p2035_p13)
}
 0x2f6   :  { %1609 = dma.vmem_to_hbm [thread:$0]  %s1604_s11, 8192, %s2514_s7, [#allocation4], %s2058_s28, %s2058_s28, %s2059_s0  }
 0x2f7   :  { %2045 = dma.done.wait [#allocation4], 8192  }
 0x2f8   :  { %2046 = vsyncadd [#allocation4], 4294959104 }
 0x2f9   :  { %2047 = dma.done.wait [#allocation13], 8192  }
 0x2fa   :  { %2048 = vsyncadd [#allocation13], 4294959104 }
 0x2fb   :  { %1628 = vsyncpa [#allocation3], 1 }
 0x2fc   :  { %1629 = vsyncpa [#allocation6], 1 }
 0x2fd   :  { %1630 = vsyncpa [#allocation9], 1 }
 0x2fe   :  { %1631 = vsyncpa [#allocation4], 1 }
 0x2ff   :  { %1632 = vsyncpa [#allocation13], 1 }

</bundles_post_ra>
